<compile_context>
chip_gen: v7x
topology: tpu7x:2x2x1
jax: 0.10.0
libtpu: 0.0.40
codegen_flags: <defaults>
</compile_context>

<pallas_src>
import math
import functools

import jax
import jax.numpy as jnp
from jax.experimental import pallas as pl
from jax.experimental.pallas import tpu as pltpu

COMPUTE_DTYPE = jnp.bfloat16


# ------------------------------------------------------------------------------------
# small helpers
# ------------------------------------------------------------------------------------

def _pick_tile(n, target=512, mult=16):
    """Largest tile <= target that divides n and is a multiple of `mult` (else n)."""
    if n <= target:
        return n
    start = target - (target % mult)
    for t in range(start, 0, -mult):
        if n % t == 0:
            return t
    return n  # NOTE: awkward n falls back to one full block (may be large).


@functools.lru_cache(maxsize=None)
def _default_vmem_limit():
    """Generation-aware VMEM limit (~25% headroom), fallback 48 MiB."""
    try:
        cap = pltpu.get_tpu_info().vmem_capacity_bytes
        return int(cap * 0.75)
    except Exception:
        return 48 * 1024 * 1024


@functools.lru_cache(maxsize=None)
def _single_buffer_ok():
    """Probe once whether pipeline_mode=pl.Buffered(1) is supported on this runtime."""
    try:
        def k(x_ref, o_ref):
            o_ref[...] = x_ref[...] + 1.0

        x = jnp.zeros((8, 128), jnp.float32)
        out = pl.pallas_call(
            k,
            out_shape=jax.ShapeDtypeStruct((8, 128), jnp.float32),
            grid=(2,),
            in_specs=[pl.BlockSpec((8, 128), lambda i: (0, 0),
                                   pipeline_mode=pl.Buffered(1))],
            out_specs=pl.BlockSpec((8, 128), lambda i: (0, 0)),
        )(x)
        jax.block_until_ready(out)
        return True
    except Exception:
        return False


def _bcast_spec(shape, grid_rank):
    """Full-array block, identical for every grid step (weights / biases / LN params).

    Single-buffered when supported: the index map never changes, so double buffering
    only wastes VMEM.
    """
    nd = len(shape)
    if grid_rank == 2:
        imap = lambda b, t: (0,) * nd
    else:
        imap = lambda b, t, kk: (0,) * nd
    if _single_buffer_ok():
        return pl.BlockSpec(shape, imap, pipeline_mode=pl.Buffered(1))
    return pl.BlockSpec(shape, imap)


# ------------------------------------------------------------------------------------
# fused attention (+ optional PE adds, + residual, + LayerNorm), streaming over Nk
# ------------------------------------------------------------------------------------

def _make_attn_ln_kernel(num_heads, add_q_pe, add_k_pe, add_residual, eps):
    def kernel(*refs):
        it = iter(refs)
        q_ref = next(it)
        qpe_ref = next(it) if add_q_pe else None
        kv_ref = next(it)                       # k and v share this tensor (v = kv, k = kv [+pe])
        kpe_ref = next(it) if add_k_pe else None
        wq_t = next(it); bq = next(it)
        wk_t = next(it); bk = next(it)
        wv_t = next(it); bv = next(it)
        wo_t = next(it); bo = next(it)
        gamma = next(it); beta = next(it)
        out_ref = next(it)
        m_scr = next(it)                        # (H, Tq, 1)  f32 running max
        l_scr = next(it)                        # (H, Tq, 1)  f32 running denom
        acc_scr = next(it)                      # (H, Tq, dh) f32 running context
        ctx_scr = next(it)                      # (Tq, d_int) f32, finalize only

        kk = pl.program_id(2)

        @pl.when(kk == 0)
        def _init():
            m_scr[...] = jnp.full(m_scr.shape, -jnp.inf, dtype=m_scr.dtype)
            l_scr[...] = jnp.zeros(l_scr.shape, dtype=l_scr.dtype)
            acc_scr[...] = jnp.zeros(acc_scr.shape, dtype=acc_scr.dtype)

        q_base = q_ref[0]                                       # (Tq, C) bf16 residual source
        q_in = (q_base + qpe_ref[0]) if add_q_pe else q_base
        v_in = kv_ref[0]                                        # (Tk, C) bf16
        k_in = (v_in + kpe_ref[0]) if add_k_pe else v_in

        # full-width projections (bf16 MXU operands, f32 accumulation)
        qp = jnp.dot(q_in, wq_t[...], preferred_element_type=jnp.float32) + bq[...]
        kp = jnp.dot(k_in, wk_t[...], preferred_element_type=jnp.float32) + bk[...]
        vp = jnp.dot(v_in, wv_t[...], preferred_element_type=jnp.float32) + bv[...]

        d_int = qp.shape[-1]
        dh = d_int // num_heads
        scale = 1.0 / math.sqrt(dh)
        nt_dims = (((1,), (1,)), ((), ()))      # contract the dh axes (no explicit .T)

        # online-softmax update per head (accumulators are head-major full-block stores,
        # no masked sub-lane writes on the streaming path)
        for h in range(num_heads):
            sl = slice(h * dh, (h + 1) * dh)
            qh = qp[:, sl].astype(jnp.bfloat16)
            kh = kp[:, sl].astype(jnp.bfloat16)
            vh = vp[:, sl].astype(jnp.bfloat16)
            logits = jax.lax.dot_general(qh, kh, nt_dims,
                                         preferred_element_type=jnp.float32) * scale
            m_prev = m_scr[h]
            m_new = jnp.maximum(m_prev, jnp.max(logits, axis=-1, keepdims=True))
            alpha = jnp.exp(m_prev - m_new)
            p = jnp.exp(logits - m_new)
            l_scr[h] = alpha * l_scr[h] + jnp.sum(p, axis=-1, keepdims=True)
            acc_scr[h] = alpha * acc_scr[h] + jnp.dot(
                p.astype(jnp.bfloat16), vh, preferred_element_type=jnp.float32)
            m_scr[h] = m_new

        @pl.when(kk == pl.num_programs(2) - 1)
        def _finalize():
            # recombine heads once per output tile, then single full-contraction out-proj
            for h in range(num_heads):
                inv_l = pl.reciprocal(l_scr[h], approx=True)
                ctx_scr[:, h * dh:(h + 1) * dh] = acc_scr[h] * inv_l
            attn_out = jnp.dot(ctx_scr[...].astype(jnp.bfloat16), wo_t[...],
                               preferred_element_type=jnp.float32) + bo[...]
            x = q_base.astype(jnp.float32) + attn_out if add_residual else attn_out
            mu = jnp.mean(x, axis=-1, keepdims=True)
            xc = x - mu
            var = jnp.mean(xc * xc, axis=-1, keepdims=True)
            y = xc * jax.lax.rsqrt(var + eps) * gamma[...] + beta[...]
            out_ref[0] = y.astype(out_ref.dtype)

    return kernel


def fused_attention_ln(q, kv, attn_params, ln_params, num_heads, *,
                       q_pe=None, k_pe=None, add_residual=True, eps=1e-5,
                       q_tile_target=512, k_tile_target=512):
    """LayerNorm( [q +] Attention(q[+q_pe], kv[+k_pe], kv) ), tiled over q, streamed over kv."""
    wq_t, bq, wk_t, bk, wv_t, bv, wo_t, bo = attn_params
    gamma, beta = ln_params
    B, Tq, C = q.shape
    Nk = kv.shape[1]
    d_int = wq_t.shape[1]
    assert d_int % num_heads == 0
    dh = d_int // num_heads

    q_tile = _pick_tile(Tq, q_tile_target)
    k_tile = _pick_tile(Nk, k_tile_target)
    n_q_tiles = Tq // q_tile
    n_k_tiles = Nk // k_tile

    add_q_pe = q_pe is not None
    add_k_pe = k_pe is not None
    kernel = _make_attn_ln_kernel(num_heads, add_q_pe, add_k_pe, add_residual, eps)

    q_spec = pl.BlockSpec((1, q_tile, C), lambda b, t, kk: (b, t, 0))
    kv_spec = pl.BlockSpec((1, k_tile, C), lambda b, t, kk: (b, kk, 0))

    inputs, in_specs = [q], [q_spec]
    if add_q_pe:
        inputs.append(q_pe); in_specs.append(q_spec)
    inputs.append(kv); in_specs.append(kv_spec)
    if add_k_pe:
        inputs.append(k_pe); in_specs.append(kv_spec)
    for w in (wq_t, bq, wk_t, bk, wv_t, bv, wo_t, bo, gamma, beta):
        inputs.append(w); in_specs.append(_bcast_spec(w.shape, 3))

    scratch = [
        pltpu.VMEM((num_heads, q_tile, 1), jnp.float32),    # m
        pltpu.VMEM((num_heads, q_tile, 1), jnp.float32),    # l
        pltpu.VMEM((num_heads, q_tile, dh), jnp.float32),   # acc (head-major)
        pltpu.VMEM((q_tile, d_int), jnp.float32),           # ctx (finalize only)
    ]

    return pl.pallas_call(
        kernel,
        out_shape=jax.ShapeDtypeStruct((B, Tq, C), q.dtype),
        grid=(B, n_q_tiles, n_k_tiles),
        in_specs=in_specs,
        out_specs=pl.BlockSpec((1, q_tile, C), lambda b, t, kk: (b, t, 0)),
        scratch_shapes=scratch,
        compiler_params=pltpu.CompilerParams(
            dimension_semantics=("parallel", "parallel", "arbitrary"),
            vmem_limit_bytes=_default_vmem_limit()),
    )(*inputs)


# ------------------------------------------------------------------------------------
# fused MLP (+ residual + LayerNorm) kernel
# ------------------------------------------------------------------------------------

def _mlp_ln_kernel(x_ref, w1_t, b1, w2_t, b2, gamma, beta, o_ref, *, eps):
    x = x_ref[0]                                                # (tile, C) bf16
    h = jnp.dot(x, w1_t[...], preferred_element_type=jnp.float32) + b1[...]
    h = jnp.maximum(h, 0.0)                                     # block default act = ReLU
    m = jnp.dot(h.astype(jnp.bfloat16), w2_t[...],
                preferred_element_type=jnp.float32) + b2[...]
    y = x.astype(jnp.float32) + m
    mu = jnp.mean(y, axis=-1, keepdims=True)
    yc = y - mu
    var = jnp.mean(yc * yc, axis=-1, keepdims=True)
    z = yc * jax.lax.rsqrt(var + eps) * gamma[...] + beta[...]
    o_ref[0] = z.astype(o_ref.dtype)


def fused_mlp_ln(x, mlp_params, ln_params, *, eps=1e-5, tile_target=512):
    w1_t, b1, w2_t, b2 = mlp_params
    gamma, beta = ln_params
    B, N, C = x.shape
    tile = _pick_tile(N, tile_target)
    n_tiles = N // tile

    kernel = functools.partial(_mlp_ln_kernel, eps=eps)
    inputs = [x]
    in_specs = [pl.BlockSpec((1, tile, C), lambda b, t: (b, t, 0))]
    for w in (w1_t, b1, w2_t, b2, gamma, beta):
        inputs.append(w); in_specs.append(_bcast_spec(w.shape, 2))

    return pl.pallas_call(
        kernel,
        out_shape=jax.ShapeDtypeStruct((B, N, C), x.dtype),
        grid=(B, n_tiles),
        in_specs=in_specs,
        out_specs=pl.BlockSpec((1, tile, C), lambda b, t: (b, t, 0)),
        compiler_params=pltpu.CompilerParams(
            dimension_semantics=("parallel", "parallel"),
            vmem_limit_bytes=_default_vmem_limit()),
    )(*inputs)


# ------------------------------------------------------------------------------------
# parameter prep (host-side, one-time): PyTorch (out, in) -> kernel-ready bf16 (in, out)
# ------------------------------------------------------------------------------------

def prepare_params(params, compute_dtype=COMPUTE_DTYPE):
    def t_attn(p):
        wq, bq, wk, bk, wv, bv, wo, bo = p
        return (wq.T.astype(compute_dtype), bq, wk.T.astype(compute_dtype), bk,
                wv.T.astype(compute_dtype), bv, wo.T.astype(compute_dtype), bo)

    def t_mlp(p):
        w1, b1, w2, b2 = p
        return (w1.T.astype(compute_dtype), b1, w2.T.astype(compute_dtype), b2)

    out = dict(params)
    for name in ("self_attn", "cross_t2i", "cross_i2t"):
        out[name] = t_attn(params[name])
    out["mlp"] = t_mlp(params["mlp"])
    return out


# ------------------------------------------------------------------------------------
# TwoWayAttentionBlock forward (Pallas-backed, fully fused)
# ------------------------------------------------------------------------------------

def two_way_attention_block(queries, keys, query_pe, key_pe, kparams,
                            num_heads, skip_first_layer_pe=False):
    out_dtype = queries.dtype
    # cast the activation / PE streams to bf16 once (halves HBM traffic everywhere)
    q = queries.astype(COMPUTE_DTYPE)
    k = keys.astype(COMPUTE_DTYPE)
    qpe = query_pe.astype(COMPUTE_DTYPE)
    kpe = key_pe.astype(COMPUTE_DTYPE)

    # (1) self-attention of sparse tokens (+ norm1)
    if skip_first_layer_pe:
        q = fused_attention_ln(q, q, kparams["self_attn"], kparams["norm1"], num_heads,
                               q_pe=None, k_pe=None, add_residual=False)
    else:
        q = fused_attention_ln(q, q, kparams["self_attn"], kparams["norm1"], num_heads,
                               q_pe=qpe, k_pe=qpe, add_residual=True)

    # (2) cross attention: tokens -> image (+ norm2); image K/V streamed over Nk tiles
    q = fused_attention_ln(q, k, kparams["cross_t2i"], kparams["norm2"], num_heads,
                           q_pe=qpe, k_pe=kpe, add_residual=True)

    # (3) MLP on sparse tokens (+ norm3)
    q = fused_mlp_ln(q, kparams["mlp"], kparams["norm3"])

    # (4) cross attention: image -> tokens (+ norm4), tiled over the image-token axis
    # TODO(synk): the projected K/V of the small token set are recomputed per image
    #             q-tile; caching them once is a minor follow-up (review item 9).
    k = fused_attention_ln(k, q, kparams["cross_i2t"], kparams["norm4"], num_heads,
                           q_pe=kpe, k_pe=qpe, add_residual=True)

    return q.astype(out_dtype), k.astype(out_dtype)


# ------------------------------------------------------------------------------------
# Pure-JAX f32 reference (for correctness check) -- uses the untransposed params
# ------------------------------------------------------------------------------------

def _ref_attention(q, k, v, params, num_heads):
    wq, bq, wk, bk, wv, bv, wo, bo = params
    qp = q @ wq.T + bq[0]
    kp = k @ wk.T + bk[0]
    vp = v @ wv.T + bv[0]
    B, Nq, D = qp.shape
    Nk = kp.shape[1]
    dh = D // num_heads
    qh = qp.reshape(B, Nq, num_heads, dh).transpose(0, 2, 1, 3)
    kh = kp.reshape(B, Nk, num_heads, dh).transpose(0, 2, 1, 3)
    vh = vp.reshape(B, Nk, num_heads, dh).transpose(0, 2, 1, 3)
    attn = jnp.einsum("bhqd,bhkd->bhqk", qh, kh) / math.sqrt(dh)
    attn = jax.nn.softmax(attn, axis=-1)
    oh = jnp.einsum("bhqk,bhkd->bhqd", attn, vh)
    o = oh.transpose(0, 2, 1, 3).reshape(B, Nq, D)
    return o @ wo.T + bo[0]


def _ref_ln(x, gamma, beta, eps=1e-5):
    mu = jnp.mean(x, axis=-1, keepdims=True)
    var = jnp.mean((x - mu) ** 2, axis=-1, keepdims=True)
    return (x - mu) / jnp.sqrt(var + eps) * gamma[0] + beta[0]


def _ref_block(queries, keys, query_pe, key_pe, params, num_heads):
    q = queries + query_pe
    attn_out = _ref_attention(q, q, queries, params["self_attn"], num_heads)
    queries = _ref_ln(queries + attn_out, *params["norm1"])
    q = queries + query_pe
    k = keys + key_pe
    attn_out = _ref_attention(q, k, keys, params["cross_t2i"], num_heads)
    queries = _ref_ln(queries + attn_out, *params["norm2"])
    w1, b1, w2, b2 = params["mlp"]
    h = jnp.maximum(queries @ w1.T + b1[0], 0.0)
    mlp_out = h @ w2.T + b2[0]
    queries = _ref_ln(queries + mlp_out, *params["norm3"])
    q = queries + query_pe
    k = keys + key_pe
    attn_out = _ref_attention(k, q, queries, params["cross_i2t"], num_heads)
    keys = _ref_ln(keys + attn_out, *params["norm4"])
    return queries, keys


# ------------------------------------------------------------------------------------
# Deterministic parameter construction (PyTorch weight convention, f32)
# ------------------------------------------------------------------------------------

def _make_linear(key, d_out, d_in, scale=0.05):
    kw, kb = jax.random.split(key)
    w = scale * jax.random.normal(kw, (d_out, d_in), jnp.float32)
    b = scale * jax.random.normal(kb, (1, d_out), jnp.float32)
    return w, b


def _make_attention_params(key, embed_dim, downsample_rate=1):
    d_int = embed_dim // downsample_rate
    ks = jax.random.split(key, 4)
    wq, bq = _make_linear(ks[0], d_int, embed_dim)
    wk, bk = _make_linear(ks[1], d_int, embed_dim)
    wv, bv = _make_linear(ks[2], d_int, embed_dim)
    wo, bo = _make_linear(ks[3], embed_dim, d_int)
    return (wq, bq, wk, bk, wv, bv, wo, bo)


def _make_ln_params(key, dim):
    kg, kb = jax.random.split(key)
    gamma = 1.0 + 0.05 * jax.random.normal(kg, (1, dim), jnp.float32)
    beta = 0.05 * jax.random.normal(kb, (1, dim), jnp.float32)
    return gamma, beta


def make_params(key, embed_dim, mlp_dim, attention_downsample_rate=2):
    ks = jax.random.split(key, 8)
    w1, b1 = _make_linear(ks[5], mlp_dim, embed_dim)
    w2, b2 = _make_linear(ks[6], embed_dim, mlp_dim)
    return {
        "self_attn": _make_attention_params(ks[0], embed_dim, 1),
        "cross_t2i": _make_attention_params(ks[1], embed_dim, attention_downsample_rate),
        "cross_i2t": _make_attention_params(ks[2], embed_dim, attention_downsample_rate),
        "norm1": _make_ln_params(ks[3], embed_dim),
        "norm2": _make_ln_params(ks[4], embed_dim),
        "norm3": _make_ln_params(ks[7], embed_dim),
        "norm4": _make_ln_params(jax.random.fold_in(key, 99), embed_dim),
        "mlp": (w1, b1, w2, b2),
    }


# ------------------------------------------------------------------------------------

if __name__ == "__main__":
    B = 2            # batch
    Nq = 8           # number of sparse (token) queries
    HW = 32          # dense image embedding spatial side -> Nk = HW*HW tokens
    Nk = HW * HW     # 1024: exercises the streamed-Nk online softmax (>1 k tile)
    C = 64           # embedding_dim
    num_heads = 4
    mlp_dim = 128
    downsample_rate = 2

    key = jax.random.PRNGKey(0)
    k_in, k_par = jax.random.split(key)
    ks = jax.random.split(k_in, 4)
    queries = jax.random.normal(ks[0], (B, Nq, C), jnp.float32)
    keys = jax.random.normal(ks[1], (B, Nk, C), jnp.float32)
    query_pe = jax.random.normal(ks[2], (B, Nq, C), jnp.float32)
    key_pe = jax.random.normal(ks[3], (B, Nk, C), jnp.float32)

    params = make_params(jax.random.PRNGKey(42), C, mlp_dim, downsample_rate)
    kparams = prepare_params(params)   # one-time host-side transposes + bf16 cast

    q_out, k_out = two_way_attention_block(
        queries, keys, query_pe, key_pe, kparams,
        num_heads=num_heads, skip_first_layer_pe=False)
    q_out = jax.block_until_ready(q_out)
    k_out = jax.block_until_ready(k_out)

    # sanity check against pure-JAX f32 reference (kernel runs in bf16 -> loose tol)
    q_ref, k_ref = _ref_block(queries, keys, query_pe, key_pe, params, num_heads)
    assert jnp.allclose(q_out, q_ref, atol=5e-2, rtol=5e-2), "queries mismatch"
    assert jnp.allclose(k_out, k_ref, atol=5e-2, rtol=5e-2), "keys mismatch"

    print("KERNEL_OK")
</pallas_src>

<mosaic_0001>
module attributes {stable_mosaic.version = 11 : i64} {
  func.func @k(%arg0: i32, %arg1: memref<8x128xf32, #tpu.memory_space<vmem>>, %arg2: memref<8x128xf32, #tpu.memory_space<vmem>>) attributes {dimension_semantics = [#tpu.dimension_semantics<arbitrary>], iteration_bounds = array<i64: 2>, scalar_prefetch = 0 : i64, scratch_operands = 0 : i64, tpu.core_type = #tpu.core_type<tc>, window_params = [{pipeline_mode = #tpu.pipeline_mode<synchronous>, transform_indices = @transform_0, window_bounds = array<i64: 8, 128>}, {pipeline_mode = #tpu.pipeline_mode<synchronous>, transform_indices = @transform_1, window_bounds = array<i64: 8, 128>}]} {
    %c0 = arith.constant 0 : index
    %c0_0 = arith.constant 0 : index
    %0 = vector.load %arg1[%c0, %c0_0] : memref<8x128xf32, #tpu.memory_space<vmem>>, vector<8x128xf32>
    %cst = arith.constant 1.000000e+00 : f32
    %1 = vector.broadcast %cst : f32 to vector<8x128xf32>
    %2 = arith.addf %0, %1 : vector<8x128xf32>
    %c0_1 = arith.constant 0 : index
    %c0_2 = arith.constant 0 : index
    %3 = vector.load %arg2[%c0_1, %c0_2] : memref<8x128xf32, #tpu.memory_space<vmem>>, vector<8x128xf32>
    tpu.vector_store %arg2[%c0_1, %c0_2], %2 {strides = array<i32>} : memref<8x128xf32, #tpu.memory_space<vmem>>, vector<8x128xf32>,
    return
  }
  func.func @transform_0(%arg0: i32) -> (i32, i32) {
    %c0_i32 = arith.constant 0 : i32
    %c0_i32_0 = arith.constant 0 : i32
    %c0_i32_1 = arith.constant 0 : i32
    return %c0_i32, %c0_i32_0 : i32, i32
  }
  func.func @transform_1(%arg0: i32) -> (i32, i32) {
    %c0_i32 = arith.constant 0 : i32
    %c0_i32_0 = arith.constant 0 : i32
    %c0_i32_1 = arith.constant 0 : i32
    return %c0_i32, %c0_i32_0 : i32, i32
  }
}

module attributes {stable_mosaic.version = 11 : i64} {
  func.func @kernel(%arg0: i32, %arg1: i32, %arg2: i32, %arg3: memref<1x8x64xbf16, #tpu.memory_space<vmem>>, %arg4: memref<1x8x64xbf16, #tpu.memory_space<vmem>>, %arg5: memref<1x8x64xbf16, #tpu.memory_space<vmem>>, %arg6: memref<1x8x64xbf16, #tpu.memory_space<vmem>>, %arg7: memref<64x64xbf16, #tpu.memory_space<vmem>>, %arg8: memref<1x64xf32, #tpu.memory_space<vmem>>, %arg9: memref<64x64xbf16, #tpu.memory_space<vmem>>, %arg10: memref<1x64xf32, #tpu.memory_space<vmem>>, %arg11: memref<64x64xbf16, #tpu.memory_space<vmem>>, %arg12: memref<1x64xf32, #tpu.memory_space<vmem>>, %arg13: memref<64x64xbf16, #tpu.memory_space<vmem>>, %arg14: memref<1x64xf32, #tpu.memory_space<vmem>>, %arg15: memref<1x64xf32, #tpu.memory_space<vmem>>, %arg16: memref<1x64xf32, #tpu.memory_space<vmem>>, %arg17: memref<1x8x64xbf16, #tpu.memory_space<vmem>>, %arg18: memref<4x8x1xf32, #tpu.memory_space<vmem>>, %arg19: memref<4x8x1xf32, #tpu.memory_space<vmem>>, %arg20: memref<4x8x16xf32, #tpu.memory_space<vmem>>, %arg21: memref<8x64xf32, #tpu.memory_space<vmem>>) attributes {dimension_semantics = [#tpu.dimension_semantics<parallel>, #tpu.dimension_semantics<parallel>, #tpu.dimension_semantics<arbitrary>], iteration_bounds = array<i64: 2, 1, 1>, scalar_prefetch = 0 : i64, scratch_operands = 4 : i64, tpu.core_type = #tpu.core_type<tc>, window_params = [{transform_indices = @transform_0, window_bounds = array<i64: 1, 8, 64>}, {transform_indices = @transform_1, window_bounds = array<i64: 1, 8, 64>}, {transform_indices = @transform_2, window_bounds = array<i64: 1, 8, 64>}, {transform_indices = @transform_3, window_bounds = array<i64: 1, 8, 64>}, {pipeline_mode = #tpu.pipeline_mode<synchronous>, transform_indices = @transform_4, window_bounds = array<i64: 64, 64>}, {pipeline_mode = #tpu.pipeline_mode<synchronous>, transform_indices = @transform_5, window_bounds = array<i64: 1, 64>}, {pipeline_mode = #tpu.pipeline_mode<synchronous>, transform_indices = @transform_6, window_bounds = array<i64: 64, 64>}, {pipeline_mode = #tpu.pipeline_mode<synchronous>, transform_indices = @transform_7, window_bounds = array<i64: 1, 64>}, {pipeline_mode = #tpu.pipeline_mode<synchronous>, transform_indices = @transform_8, window_bounds = array<i64: 64, 64>}, {pipeline_mode = #tpu.pipeline_mode<synchronous>, transform_indices = @transform_9, window_bounds = array<i64: 1, 64>}, {pipeline_mode = #tpu.pipeline_mode<synchronous>, transform_indices = @transform_10, window_bounds = array<i64: 64, 64>}, {pipeline_mode = #tpu.pipeline_mode<synchronous>, transform_indices = @transform_11, window_bounds = array<i64: 1, 64>}, {pipeline_mode = #tpu.pipeline_mode<synchronous>, transform_indices = @transform_12, window_bounds = array<i64: 1, 64>}, {pipeline_mode = #tpu.pipeline_mode<synchronous>, transform_indices = @transform_13, window_bounds = array<i64: 1, 64>}, {transform_indices = @transform_14, window_bounds = array<i64: 1, 8, 64>}]} {
    %c0_i32 = arith.constant 0 : i32
    %0 = arith.cmpi eq, %arg2, %c0_i32 : i32
    %1 = arith.extui %0 : i1 to i32
    %c0_i32_0 = arith.constant 0 : i32
    %2 = arith.cmpi ne, %1, %c0_i32_0 : i32
    scf.if %2 {
      %cst_117 = arith.constant 0xFF800000 : f32
      %195 = vector.broadcast %cst_117 : f32 to vector<4x8x1xf32>
      %c0_118 = arith.constant 0 : index
      %c0_119 = arith.constant 0 : index
      %c0_120 = arith.constant 0 : index
      %196 = vector.load %arg18[%c0_118, %c0_119, %c0_120] : memref<4x8x1xf32, #tpu.memory_space<vmem>>, vector<4x8x1xf32>
      tpu.vector_store %arg18[%c0_118, %c0_119, %c0_120], %195 {strides = array<i32>} : memref<4x8x1xf32, #tpu.memory_space<vmem>>, vector<4x8x1xf32>,
      %cst_121 = arith.constant 0.000000e+00 : f32
      %197 = vector.broadcast %cst_121 : f32 to vector<4x8x1xf32>
      %c0_122 = arith.constant 0 : index
      %c0_123 = arith.constant 0 : index
      %c0_124 = arith.constant 0 : index
      %198 = vector.load %arg19[%c0_122, %c0_123, %c0_124] : memref<4x8x1xf32, #tpu.memory_space<vmem>>, vector<4x8x1xf32>
      tpu.vector_store %arg19[%c0_122, %c0_123, %c0_124], %197 {strides = array<i32>} : memref<4x8x1xf32, #tpu.memory_space<vmem>>, vector<4x8x1xf32>,
      %cst_125 = arith.constant 0.000000e+00 : f32
      %199 = vector.broadcast %cst_125 : f32 to vector<4x8x16xf32>
      %c0_126 = arith.constant 0 : index
      %c0_127 = arith.constant 0 : index
      %c0_128 = arith.constant 0 : index
      %200 = vector.load %arg20[%c0_126, %c0_127, %c0_128] : memref<4x8x16xf32, #tpu.memory_space<vmem>>, vector<4x8x16xf32>
      tpu.vector_store %arg20[%c0_126, %c0_127, %c0_128], %199 {strides = array<i32>} : memref<4x8x16xf32, #tpu.memory_space<vmem>>, vector<4x8x16xf32>,
    } else {
    }
    %c0 = arith.constant 0 : index
    %c0_1 = arith.constant 0 : index
    %c0_2 = arith.constant 0 : index
    %3 = vector.load %arg3[%c0, %c0_1, %c0_2] : memref<1x8x64xbf16, #tpu.memory_space<vmem>>, vector<1x8x64xbf16>
    %4 = vector.shape_cast %3 : vector<1x8x64xbf16> to vector<8x64xbf16>
    %c0_3 = arith.constant 0 : index
    %c0_4 = arith.constant 0 : index
    %c0_5 = arith.constant 0 : index
    %5 = vector.load %arg4[%c0_3, %c0_4, %c0_5] : memref<1x8x64xbf16, #tpu.memory_space<vmem>>, vector<1x8x64xbf16>
    %6 = vector.shape_cast %5 : vector<1x8x64xbf16> to vector<8x64xbf16>
    %7 = arith.addf %4, %6 : vector<8x64xbf16>
    %c0_6 = arith.constant 0 : index
    %c0_7 = arith.constant 0 : index
    %c0_8 = arith.constant 0 : index
    %8 = vector.load %arg5[%c0_6, %c0_7, %c0_8] : memref<1x8x64xbf16, #tpu.memory_space<vmem>>, vector<1x8x64xbf16>
    %9 = vector.shape_cast %8 : vector<1x8x64xbf16> to vector<8x64xbf16>
    %c0_9 = arith.constant 0 : index
    %c0_10 = arith.constant 0 : index
    %c0_11 = arith.constant 0 : index
    %10 = vector.load %arg6[%c0_9, %c0_10, %c0_11] : memref<1x8x64xbf16, #tpu.memory_space<vmem>>, vector<1x8x64xbf16>
    %11 = vector.shape_cast %10 : vector<1x8x64xbf16> to vector<8x64xbf16>
    %12 = arith.addf %9, %11 : vector<8x64xbf16>
    %c0_12 = arith.constant 0 : index
    %c0_13 = arith.constant 0 : index
    %13 = vector.load %arg7[%c0_12, %c0_13] : memref<64x64xbf16, #tpu.memory_space<vmem>>, vector<64x64xbf16>
    %cst = arith.constant dense<0.000000e+00> : vector<8x64xf32>
    %14 = tpu.matmul %7, %13, %cst {dimension_numbers = #tpu.dot_dimension_numbers<[1], [0], [0], [1], [0, 0, 1, 1], [], []>} : vector<8x64xbf16>, vector<64x64xbf16>, vector<8x64xf32> -> vector<8x64xf32>
    %c0_14 = arith.constant 0 : index
    %c0_15 = arith.constant 0 : index
    %15 = vector.load %arg8[%c0_14, %c0_15] : memref<1x64xf32, #tpu.memory_space<vmem>>, vector<1x64xf32>
    %16 = vector.broadcast %15 : vector<1x64xf32> to vector<8x64xf32>
    %17 = arith.addf %14, %16 : vector<8x64xf32>
    %c0_16 = arith.constant 0 : index
    %c0_17 = arith.constant 0 : index
    %18 = vector.load %arg9[%c0_16, %c0_17] : memref<64x64xbf16, #tpu.memory_space<vmem>>, vector<64x64xbf16>
    %cst_18 = arith.constant dense<0.000000e+00> : vector<8x64xf32>
    %19 = tpu.matmul %12, %18, %cst_18 {dimension_numbers = #tpu.dot_dimension_numbers<[1], [0], [0], [1], [0, 0, 1, 1], [], []>} : vector<8x64xbf16>, vector<64x64xbf16>, vector<8x64xf32> -> vector<8x64xf32>
    %c0_19 = arith.constant 0 : index
    %c0_20 = arith.constant 0 : index
    %20 = vector.load %arg10[%c0_19, %c0_20] : memref<1x64xf32, #tpu.memory_space<vmem>>, vector<1x64xf32>
    %21 = vector.broadcast %20 : vector<1x64xf32> to vector<8x64xf32>
    %22 = arith.addf %19, %21 : vector<8x64xf32>
    %c0_21 = arith.constant 0 : index
    %c0_22 = arith.constant 0 : index
    %23 = vector.load %arg11[%c0_21, %c0_22] : memref<64x64xbf16, #tpu.memory_space<vmem>>, vector<64x64xbf16>
    %cst_23 = arith.constant dense<0.000000e+00> : vector<8x64xf32>
    %24 = tpu.matmul %9, %23, %cst_23 {dimension_numbers = #tpu.dot_dimension_numbers<[1], [0], [0], [1], [0, 0, 1, 1], [], []>} : vector<8x64xbf16>, vector<64x64xbf16>, vector<8x64xf32> -> vector<8x64xf32>
    %c0_24 = arith.constant 0 : index
    %c0_25 = arith.constant 0 : index
    %25 = vector.load %arg12[%c0_24, %c0_25] : memref<1x64xf32, #tpu.memory_space<vmem>>, vector<1x64xf32>
    %26 = vector.broadcast %25 : vector<1x64xf32> to vector<8x64xf32>
    %27 = arith.addf %24, %26 : vector<8x64xf32>
    %28 = vector.extract_strided_slice %17 {offsets = [0, 0], sizes = [8, 16], strides = [1, 1]} : vector<8x64xf32> to vector<8x16xf32>
    %29 = arith.truncf %28 : vector<8x16xf32> to vector<8x16xbf16>
    %30 = vector.extract_strided_slice %22 {offsets = [0, 0], sizes = [8, 16], strides = [1, 1]} : vector<8x64xf32> to vector<8x16xf32>
    %31 = arith.truncf %30 : vector<8x16xf32> to vector<8x16xbf16>
    %32 = vector.extract_strided_slice %27 {offsets = [0, 0], sizes = [8, 16], strides = [1, 1]} : vector<8x64xf32> to vector<8x16xf32>
    %33 = arith.truncf %32 : vector<8x16xf32> to vector<8x16xbf16>
    %cst_26 = arith.constant dense<0.000000e+00> : vector<8x8xf32>
    %34 = tpu.matmul %29, %31, %cst_26 {dimension_numbers = #tpu.dot_dimension_numbers<[1], [1], [0], [0], [0, 0, 1, 0], [], []>} : vector<8x16xbf16>, vector<8x16xbf16>, vector<8x8xf32> -> vector<8x8xf32>
    %cst_27 = arith.constant 2.500000e-01 : f32
    %35 = vector.broadcast %cst_27 : f32 to vector<8x8xf32>
    %36 = arith.mulf %34, %35 : vector<8x8xf32>
    %c0_28 = arith.constant 0 : index
    %c0_29 = arith.constant 0 : index
    %c0_30 = arith.constant 0 : index
    %37 = vector.load %arg18[%c0_28, %c0_29, %c0_30] : memref<4x8x1xf32, #tpu.memory_space<vmem>>, vector<1x8x1xf32>
    %38 = vector.shape_cast %37 : vector<1x8x1xf32> to vector<8x1xf32>
    %cst_31 = arith.constant dense<0xFF800000> : vector<8xf32>
    %39 = vector.multi_reduction <maximumf>, %36, %cst_31 [1] : vector<8x8xf32> to vector<8xf32>
    %40 = vector.shape_cast %39 : vector<8xf32> to vector<8x1xf32>
    %41 = arith.maximumf %38, %40 : vector<8x1xf32>
    %42 = arith.subf %38, %41 : vector<8x1xf32>
    %43 = math.exp %42 : vector<8x1xf32>
    %44 = vector.broadcast %41 : vector<8x1xf32> to vector<8x8xf32>
    %45 = arith.subf %36, %44 : vector<8x8xf32>
    %46 = math.exp %45 : vector<8x8xf32>
    %c0_32 = arith.constant 0 : index
    %c0_33 = arith.constant 0 : index
    %c0_34 = arith.constant 0 : index
    %47 = vector.load %arg19[%c0_32, %c0_33, %c0_34] : memref<4x8x1xf32, #tpu.memory_space<vmem>>, vector<1x8x1xf32>
    %48 = vector.shape_cast %47 : vector<1x8x1xf32> to vector<8x1xf32>
    %49 = arith.mulf %43, %48 : vector<8x1xf32>
    %cst_35 = arith.constant dense<0.000000e+00> : vector<8xf32>
    %50 = vector.multi_reduction <add>, %46, %cst_35 [1] : vector<8x8xf32> to vector<8xf32>
    %51 = vector.shape_cast %50 : vector<8xf32> to vector<8x1xf32>
    %52 = arith.addf %49, %51 : vector<8x1xf32>
    %c0_36 = arith.constant 0 : index
    %c0_37 = arith.constant 0 : index
    %c0_38 = arith.constant 0 : index
    %53 = vector.load %arg19[%c0_36, %c0_37, %c0_38] : memref<4x8x1xf32, #tpu.memory_space<vmem>>, vector<1x8x1xf32>
    %54 = vector.shape_cast %53 : vector<1x8x1xf32> to vector<8x1xf32>
    %55 = vector.shape_cast %52 : vector<8x1xf32> to vector<1x8x1xf32>
    tpu.vector_store %arg19[%c0_36, %c0_37, %c0_38], %55 {strides = array<i32>} : memref<4x8x1xf32, #tpu.memory_space<vmem>>, vector<1x8x1xf32>,
    %c0_39 = arith.constant 0 : index
    %c0_40 = arith.constant 0 : index
    %c0_41 = arith.constant 0 : index
    %56 = vector.load %arg20[%c0_39, %c0_40, %c0_41] : memref<4x8x16xf32, #tpu.memory_space<vmem>>, vector<1x8x16xf32>
    %57 = vector.shape_cast %56 : vector<1x8x16xf32> to vector<8x16xf32>
    %58 = vector.broadcast %43 : vector<8x1xf32> to vector<8x16xf32>
    %59 = arith.mulf %58, %57 : vector<8x16xf32>
    %60 = arith.truncf %46 : vector<8x8xf32> to vector<8x8xbf16>
    %cst_42 = arith.constant dense<0.000000e+00> : vector<8x16xf32>
    %61 = tpu.matmul %60, %33, %cst_42 {dimension_numbers = #tpu.dot_dimension_numbers<[1], [0], [0], [1], [0, 0, 1, 1], [], []>} : vector<8x8xbf16>, vector<8x16xbf16>, vector<8x16xf32> -> vector<8x16xf32>
    %62 = arith.addf %59, %61 : vector<8x16xf32>
    %c0_43 = arith.constant 0 : index
    %c0_44 = arith.constant 0 : index
    %c0_45 = arith.constant 0 : index
    %63 = vector.load %arg20[%c0_43, %c0_44, %c0_45] : memref<4x8x16xf32, #tpu.memory_space<vmem>>, vector<1x8x16xf32>
    %64 = vector.shape_cast %63 : vector<1x8x16xf32> to vector<8x16xf32>
    %65 = vector.shape_cast %62 : vector<8x16xf32> to vector<1x8x16xf32>
    tpu.vector_store %arg20[%c0_43, %c0_44, %c0_45], %65 {strides = array<i32>} : memref<4x8x16xf32, #tpu.memory_space<vmem>>, vector<1x8x16xf32>,
    %c0_46 = arith.constant 0 : index
    %c0_47 = arith.constant 0 : index
    %c0_48 = arith.constant 0 : index
    %66 = vector.load %arg18[%c0_46, %c0_47, %c0_48] : memref<4x8x1xf32, #tpu.memory_space<vmem>>, vector<1x8x1xf32>
    %67 = vector.shape_cast %66 : vector<1x8x1xf32> to vector<8x1xf32>
    %68 = vector.shape_cast %41 : vector<8x1xf32> to vector<1x8x1xf32>
    tpu.vector_store %arg18[%c0_46, %c0_47, %c0_48], %68 {strides = array<i32>} : memref<4x8x1xf32, #tpu.memory_space<vmem>>, vector<1x8x1xf32>,
    %69 = vector.extract_strided_slice %17 {offsets = [0, 16], sizes = [8, 16], strides = [1, 1]} : vector<8x64xf32> to vector<8x16xf32>
    %70 = arith.truncf %69 : vector<8x16xf32> to vector<8x16xbf16>
    %71 = vector.extract_strided_slice %22 {offsets = [0, 16], sizes = [8, 16], strides = [1, 1]} : vector<8x64xf32> to vector<8x16xf32>
    %72 = arith.truncf %71 : vector<8x16xf32> to vector<8x16xbf16>
    %73 = vector.extract_strided_slice %27 {offsets = [0, 16], sizes = [8, 16], strides = [1, 1]} : vector<8x64xf32> to vector<8x16xf32>
    %74 = arith.truncf %73 : vector<8x16xf32> to vector<8x16xbf16>
    %cst_49 = arith.constant dense<0.000000e+00> : vector<8x8xf32>
    %75 = tpu.matmul %70, %72, %cst_49 {dimension_numbers = #tpu.dot_dimension_numbers<[1], [1], [0], [0], [0, 0, 1, 0], [], []>} : vector<8x16xbf16>, vector<8x16xbf16>, vector<8x8xf32> -> vector<8x8xf32>
    %cst_50 = arith.constant 2.500000e-01 : f32
    %76 = vector.broadcast %cst_50 : f32 to vector<8x8xf32>
    %77 = arith.mulf %75, %76 : vector<8x8xf32>
    %c1 = arith.constant 1 : index
    %c0_51 = arith.constant 0 : index
    %c0_52 = arith.constant 0 : index
    %78 = vector.load %arg18[%c1, %c0_51, %c0_52] : memref<4x8x1xf32, #tpu.memory_space<vmem>>, vector<1x8x1xf32>
    %79 = vector.shape_cast %78 : vector<1x8x1xf32> to vector<8x1xf32>
    %cst_53 = arith.constant dense<0xFF800000> : vector<8xf32>
    %80 = vector.multi_reduction <maximumf>, %77, %cst_53 [1] : vector<8x8xf32> to vector<8xf32>
    %81 = vector.shape_cast %80 : vector<8xf32> to vector<8x1xf32>
    %82 = arith.maximumf %79, %81 : vector<8x1xf32>
    %83 = arith.subf %79, %82 : vector<8x1xf32>
    %84 = math.exp %83 : vector<8x1xf32>
    %85 = vector.broadcast %82 : vector<8x1xf32> to vector<8x8xf32>
    %86 = arith.subf %77, %85 : vector<8x8xf32>
    %87 = math.exp %86 : vector<8x8xf32>
    %c1_54 = arith.constant 1 : index
    %c0_55 = arith.constant 0 : index
    %c0_56 = arith.constant 0 : index
    %88 = vector.load %arg19[%c1_54, %c0_55, %c0_56] : memref<4x8x1xf32, #tpu.memory_space<vmem>>, vector<1x8x1xf32>
    %89 = vector.shape_cast %88 : vector<1x8x1xf32> to vector<8x1xf32>
    %90 = arith.mulf %84, %89 : vector<8x1xf32>
    %cst_57 = arith.constant dense<0.000000e+00> : vector<8xf32>
    %91 = vector.multi_reduction <add>, %87, %cst_57 [1] : vector<8x8xf32> to vector<8xf32>
    %92 = vector.shape_cast %91 : vector<8xf32> to vector<8x1xf32>
    %93 = arith.addf %90, %92 : vector<8x1xf32>
    %c1_58 = arith.constant 1 : index
    %c0_59 = arith.constant 0 : index
    %c0_60 = arith.constant 0 : index
    %94 = vector.load %arg19[%c1_58, %c0_59, %c0_60] : memref<4x8x1xf32, #tpu.memory_space<vmem>>, vector<1x8x1xf32>
    %95 = vector.shape_cast %94 : vector<1x8x1xf32> to vector<8x1xf32>
    %96 = vector.shape_cast %93 : vector<8x1xf32> to vector<1x8x1xf32>
    tpu.vector_store %arg19[%c1_58, %c0_59, %c0_60], %96 {strides = array<i32>} : memref<4x8x1xf32, #tpu.memory_space<vmem>>, vector<1x8x1xf32>,
    %c1_61 = arith.constant 1 : index
    %c0_62 = arith.constant 0 : index
    %c0_63 = arith.constant 0 : index
    %97 = vector.load %arg20[%c1_61, %c0_62, %c0_63] : memref<4x8x16xf32, #tpu.memory_space<vmem>>, vector<1x8x16xf32>
    %98 = vector.shape_cast %97 : vector<1x8x16xf32> to vector<8x16xf32>
    %99 = vector.broadcast %84 : vector<8x1xf32> to vector<8x16xf32>
    %100 = arith.mulf %99, %98 : vector<8x16xf32>
    %101 = arith.truncf %87 : vector<8x8xf32> to vector<8x8xbf16>
    %cst_64 = arith.constant dense<0.000000e+00> : vector<8x16xf32>
    %102 = tpu.matmul %101, %74, %cst_64 {dimension_numbers = #tpu.dot_dimension_numbers<[1], [0], [0], [1], [0, 0, 1, 1], [], []>} : vector<8x8xbf16>, vector<8x16xbf16>, vector<8x16xf32> -> vector<8x16xf32>
    %103 = arith.addf %100, %102 : vector<8x16xf32>
    %c1_65 = arith.constant 1 : index
    %c0_66 = arith.constant 0 : index
    %c0_67 = arith.constant 0 : index
    %104 = vector.load %arg20[%c1_65, %c0_66, %c0_67] : memref<4x8x16xf32, #tpu.memory_space<vmem>>, vector<1x8x16xf32>
    %105 = vector.shape_cast %104 : vector<1x8x16xf32> to vector<8x16xf32>
    %106 = vector.shape_cast %103 : vector<8x16xf32> to vector<1x8x16xf32>
    tpu.vector_store %arg20[%c1_65, %c0_66, %c0_67], %106 {strides = array<i32>} : memref<4x8x16xf32, #tpu.memory_space<vmem>>, vector<1x8x16xf32>,
    %c1_68 = arith.constant 1 : index
    %c0_69 = arith.constant 0 : index
    %c0_70 = arith.constant 0 : index
    %107 = vector.load %arg18[%c1_68, %c0_69, %c0_70] : memref<4x8x1xf32, #tpu.memory_space<vmem>>, vector<1x8x1xf32>
    %108 = vector.shape_cast %107 : vector<1x8x1xf32> to vector<8x1xf32>
    %109 = vector.shape_cast %82 : vector<8x1xf32> to vector<1x8x1xf32>
    tpu.vector_store %arg18[%c1_68, %c0_69, %c0_70], %109 {strides = array<i32>} : memref<4x8x1xf32, #tpu.memory_space<vmem>>, vector<1x8x1xf32>,
    %110 = vector.extract_strided_slice %17 {offsets = [0, 32], sizes = [8, 16], strides = [1, 1]} : vector<8x64xf32> to vector<8x16xf32>
    %111 = arith.truncf %110 : vector<8x16xf32> to vector<8x16xbf16>
    %112 = vector.extract_strided_slice %22 {offsets = [0, 32], sizes = [8, 16], strides = [1, 1]} : vector<8x64xf32> to vector<8x16xf32>
    %113 = arith.truncf %112 : vector<8x16xf32> to vector<8x16xbf16>
    %114 = vector.extract_strided_slice %27 {offsets = [0, 32], sizes = [8, 16], strides = [1, 1]} : vector<8x64xf32> to vector<8x16xf32>
    %115 = arith.truncf %114 : vector<8x16xf32> to vector<8x16xbf16>
    %cst_71 = arith.constant dense<0.000000e+00> : vector<8x8xf32>
    %116 = tpu.matmul %111, %113, %cst_71 {dimension_numbers = #tpu.dot_dimension_numbers<[1], [1], [0], [0], [0, 0, 1, 0], [], []>} : vector<8x16xbf16>, vector<8x16xbf16>, vector<8x8xf32> -> vector<8x8xf32>
    %cst_72 = arith.constant 2.500000e-01 : f32
    %117 = vector.broadcast %cst_72 : f32 to vector<8x8xf32>
    %118 = arith.mulf %116, %117 : vector<8x8xf32>
    %c2 = arith.constant 2 : index
    %c0_73 = arith.constant 0 : index
    %c0_74 = arith.constant 0 : index
    %119 = vector.load %arg18[%c2, %c0_73, %c0_74] : memref<4x8x1xf32, #tpu.memory_space<vmem>>, vector<1x8x1xf32>
    %120 = vector.shape_cast %119 : vector<1x8x1xf32> to vector<8x1xf32>
    %cst_75 = arith.constant dense<0xFF800000> : vector<8xf32>
    %121 = vector.multi_reduction <maximumf>, %118, %cst_75 [1] : vector<8x8xf32> to vector<8xf32>
    %122 = vector.shape_cast %121 : vector<8xf32> to vector<8x1xf32>
    %123 = arith.maximumf %120, %122 : vector<8x1xf32>
    %124 = arith.subf %120, %123 : vector<8x1xf32>
    %125 = math.exp %124 : vector<8x1xf32>
    %126 = vector.broadcast %123 : vector<8x1xf32> to vector<8x8xf32>
    %127 = arith.subf %118, %126 : vector<8x8xf32>
    %128 = math.exp %127 : vector<8x8xf32>
    %c2_76 = arith.constant 2 : index
    %c0_77 = arith.constant 0 : index
    %c0_78 = arith.constant 0 : index
    %129 = vector.load %arg19[%c2_76, %c0_77, %c0_78] : memref<4x8x1xf32, #tpu.memory_space<vmem>>, vector<1x8x1xf32>
    %130 = vector.shape_cast %129 : vector<1x8x1xf32> to vector<8x1xf32>
    %131 = arith.mulf %125, %130 : vector<8x1xf32>
    %cst_79 = arith.constant dense<0.000000e+00> : vector<8xf32>
    %132 = vector.multi_reduction <add>, %128, %cst_79 [1] : vector<8x8xf32> to vector<8xf32>
    %133 = vector.shape_cast %132 : vector<8xf32> to vector<8x1xf32>
    %134 = arith.addf %131, %133 : vector<8x1xf32>
    %c2_80 = arith.constant 2 : index
    %c0_81 = arith.constant 0 : index
    %c0_82 = arith.constant 0 : index
    %135 = vector.load %arg19[%c2_80, %c0_81, %c0_82] : memref<4x8x1xf32, #tpu.memory_space<vmem>>, vector<1x8x1xf32>
    %136 = vector.shape_cast %135 : vector<1x8x1xf32> to vector<8x1xf32>
    %137 = vector.shape_cast %134 : vector<8x1xf32> to vector<1x8x1xf32>
    tpu.vector_store %arg19[%c2_80, %c0_81, %c0_82], %137 {strides = array<i32>} : memref<4x8x1xf32, #tpu.memory_space<vmem>>, vector<1x8x1xf32>,
    %c2_83 = arith.constant 2 : index
    %c0_84 = arith.constant 0 : index
    %c0_85 = arith.constant 0 : index
    %138 = vector.load %arg20[%c2_83, %c0_84, %c0_85] : memref<4x8x16xf32, #tpu.memory_space<vmem>>, vector<1x8x16xf32>
    %139 = vector.shape_cast %138 : vector<1x8x16xf32> to vector<8x16xf32>
    %140 = vector.broadcast %125 : vector<8x1xf32> to vector<8x16xf32>
    %141 = arith.mulf %140, %139 : vector<8x16xf32>
    %142 = arith.truncf %128 : vector<8x8xf32> to vector<8x8xbf16>
    %cst_86 = arith.constant dense<0.000000e+00> : vector<8x16xf32>
    %143 = tpu.matmul %142, %115, %cst_86 {dimension_numbers = #tpu.dot_dimension_numbers<[1], [0], [0], [1], [0, 0, 1, 1], [], []>} : vector<8x8xbf16>, vector<8x16xbf16>, vector<8x16xf32> -> vector<8x16xf32>
    %144 = arith.addf %141, %143 : vector<8x16xf32>
    %c2_87 = arith.constant 2 : index
    %c0_88 = arith.constant 0 : index
    %c0_89 = arith.constant 0 : index
    %145 = vector.load %arg20[%c2_87, %c0_88, %c0_89] : memref<4x8x16xf32, #tpu.memory_space<vmem>>, vector<1x8x16xf32>
    %146 = vector.shape_cast %145 : vector<1x8x16xf32> to vector<8x16xf32>
    %147 = vector.shape_cast %144 : vector<8x16xf32> to vector<1x8x16xf32>
    tpu.vector_store %arg20[%c2_87, %c0_88, %c0_89], %147 {strides = array<i32>} : memref<4x8x16xf32, #tpu.memory_space<vmem>>, vector<1x8x16xf32>,
    %c2_90 = arith.constant 2 : index
    %c0_91 = arith.constant 0 : index
    %c0_92 = arith.constant 0 : index
    %148 = vector.load %arg18[%c2_90, %c0_91, %c0_92] : memref<4x8x1xf32, #tpu.memory_space<vmem>>, vector<1x8x1xf32>
    %149 = vector.shape_cast %148 : vector<1x8x1xf32> to vector<8x1xf32>
    %150 = vector.shape_cast %123 : vector<8x1xf32> to vector<1x8x1xf32>
    tpu.vector_store %arg18[%c2_90, %c0_91, %c0_92], %150 {strides = array<i32>} : memref<4x8x1xf32, #tpu.memory_space<vmem>>, vector<1x8x1xf32>,
    %151 = vector.extract_strided_slice %17 {offsets = [0, 48], sizes = [8, 16], strides = [1, 1]} : vector<8x64xf32> to vector<8x16xf32>
    %152 = arith.truncf %151 : vector<8x16xf32> to vector<8x16xbf16>
    %153 = vector.extract_strided_slice %22 {offsets = [0, 48], sizes = [8, 16], strides = [1, 1]} : vector<8x64xf32> to vector<8x16xf32>
    %154 = arith.truncf %153 : vector<8x16xf32> to vector<8x16xbf16>
    %155 = vector.extract_strided_slice %27 {offsets = [0, 48], sizes = [8, 16], strides = [1, 1]} : vector<8x64xf32> to vector<8x16xf32>
    %156 = arith.truncf %155 : vector<8x16xf32> to vector<8x16xbf16>
    %cst_93 = arith.constant dense<0.000000e+00> : vector<8x8xf32>
    %157 = tpu.matmul %152, %154, %cst_93 {dimension_numbers = #tpu.dot_dimension_numbers<[1], [1], [0], [0], [0, 0, 1, 0], [], []>} : vector<8x16xbf16>, vector<8x16xbf16>, vector<8x8xf32> -> vector<8x8xf32>
    %cst_94 = arith.constant 2.500000e-01 : f32
    %158 = vector.broadcast %cst_94 : f32 to vector<8x8xf32>
    %159 = arith.mulf %157, %158 : vector<8x8xf32>
    %c3 = arith.constant 3 : index
    %c0_95 = arith.constant 0 : index
    %c0_96 = arith.constant 0 : index
    %160 = vector.load %arg18[%c3, %c0_95, %c0_96] : memref<4x8x1xf32, #tpu.memory_space<vmem>>, vector<1x8x1xf32>
    %161 = vector.shape_cast %160 : vector<1x8x1xf32> to vector<8x1xf32>
    %cst_97 = arith.constant dense<0xFF800000> : vector<8xf32>
    %162 = vector.multi_reduction <maximumf>, %159, %cst_97 [1] : vector<8x8xf32> to vector<8xf32>
    %163 = vector.shape_cast %162 : vector<8xf32> to vector<8x1xf32>
    %164 = arith.maximumf %161, %163 : vector<8x1xf32>
    %165 = arith.subf %161, %164 : vector<8x1xf32>
    %166 = math.exp %165 : vector<8x1xf32>
    %167 = vector.broadcast %164 : vector<8x1xf32> to vector<8x8xf32>
    %168 = arith.subf %159, %167 : vector<8x8xf32>
    %169 = math.exp %168 : vector<8x8xf32>
    %c3_98 = arith.constant 3 : index
    %c0_99 = arith.constant 0 : index
    %c0_100 = arith.constant 0 : index
    %170 = vector.load %arg19[%c3_98, %c0_99, %c0_100] : memref<4x8x1xf32, #tpu.memory_space<vmem>>, vector<1x8x1xf32>
    %171 = vector.shape_cast %170 : vector<1x8x1xf32> to vector<8x1xf32>
    %172 = arith.mulf %166, %171 : vector<8x1xf32>
    %cst_101 = arith.constant dense<0.000000e+00> : vector<8xf32>
    %173 = vector.multi_reduction <add>, %169, %cst_101 [1] : vector<8x8xf32> to vector<8xf32>
    %174 = vector.shape_cast %173 : vector<8xf32> to vector<8x1xf32>
    %175 = arith.addf %172, %174 : vector<8x1xf32>
    %c3_102 = arith.constant 3 : index
    %c0_103 = arith.constant 0 : index
    %c0_104 = arith.constant 0 : index
    %176 = vector.load %arg19[%c3_102, %c0_103, %c0_104] : memref<4x8x1xf32, #tpu.memory_space<vmem>>, vector<1x8x1xf32>
    %177 = vector.shape_cast %176 : vector<1x8x1xf32> to vector<8x1xf32>
    %178 = vector.shape_cast %175 : vector<8x1xf32> to vector<1x8x1xf32>
    tpu.vector_store %arg19[%c3_102, %c0_103, %c0_104], %178 {strides = array<i32>} : memref<4x8x1xf32, #tpu.memory_space<vmem>>, vector<1x8x1xf32>,
    %c3_105 = arith.constant 3 : index
    %c0_106 = arith.constant 0 : index
    %c0_107 = arith.constant 0 : index
    %179 = vector.load %arg20[%c3_105, %c0_106, %c0_107] : memref<4x8x16xf32, #tpu.memory_space<vmem>>, vector<1x8x16xf32>
    %180 = vector.shape_cast %179 : vector<1x8x16xf32> to vector<8x16xf32>
    %181 = vector.broadcast %166 : vector<8x1xf32> to vector<8x16xf32>
    %182 = arith.mulf %181, %180 : vector<8x16xf32>
    %183 = arith.truncf %169 : vector<8x8xf32> to vector<8x8xbf16>
    %cst_108 = arith.constant dense<0.000000e+00> : vector<8x16xf32>
    %184 = tpu.matmul %183, %156, %cst_108 {dimension_numbers = #tpu.dot_dimension_numbers<[1], [0], [0], [1], [0, 0, 1, 1], [], []>} : vector<8x8xbf16>, vector<8x16xbf16>, vector<8x16xf32> -> vector<8x16xf32>
    %185 = arith.addf %182, %184 : vector<8x16xf32>
    %c3_109 = arith.constant 3 : index
    %c0_110 = arith.constant 0 : index
    %c0_111 = arith.constant 0 : index
    %186 = vector.load %arg20[%c3_109, %c0_110, %c0_111] : memref<4x8x16xf32, #tpu.memory_space<vmem>>, vector<1x8x16xf32>
    %187 = vector.shape_cast %186 : vector<1x8x16xf32> to vector<8x16xf32>
    %188 = vector.shape_cast %185 : vector<8x16xf32> to vector<1x8x16xf32>
    tpu.vector_store %arg20[%c3_109, %c0_110, %c0_111], %188 {strides = array<i32>} : memref<4x8x16xf32, #tpu.memory_space<vmem>>, vector<1x8x16xf32>,
    %c3_112 = arith.constant 3 : index
    %c0_113 = arith.constant 0 : index
    %c0_114 = arith.constant 0 : index
    %189 = vector.load %arg18[%c3_112, %c0_113, %c0_114] : memref<4x8x1xf32, #tpu.memory_space<vmem>>, vector<1x8x1xf32>
    %190 = vector.shape_cast %189 : vector<1x8x1xf32> to vector<8x1xf32>
    %191 = vector.shape_cast %164 : vector<8x1xf32> to vector<1x8x1xf32>
    tpu.vector_store %arg18[%c3_112, %c0_113, %c0_114], %191 {strides = array<i32>} : memref<4x8x1xf32, #tpu.memory_space<vmem>>, vector<1x8x1xf32>,
    %c0_i32_115 = arith.constant 0 : i32
    %192 = arith.cmpi eq, %arg2, %c0_i32_115 : i32
    %193 = arith.extui %192 : i1 to i32
    %c0_i32_116 = arith.constant 0 : i32
    %194 = arith.cmpi ne, %193, %c0_i32_116 : i32
    scf.if %194 {
      %c0_117 = arith.constant 0 : index
      %c0_118 = arith.constant 0 : index
      %c0_119 = arith.constant 0 : index
      %195 = vector.load %arg19[%c0_117, %c0_118, %c0_119] : memref<4x8x1xf32, #tpu.memory_space<vmem>>, vector<1x8x1xf32>
      %196 = vector.shape_cast %195 : vector<1x8x1xf32> to vector<8x1xf32>
      %197 = tpu.reciprocal %196 {approx = true} : vector<8x1xf32> -> vector<8x1xf32>
      %c0_120 = arith.constant 0 : index
      %c0_121 = arith.constant 0 : index
      %c0_122 = arith.constant 0 : index
      %198 = vector.load %arg20[%c0_120, %c0_121, %c0_122] : memref<4x8x16xf32, #tpu.memory_space<vmem>>, vector<1x8x16xf32>
      %199 = vector.shape_cast %198 : vector<1x8x16xf32> to vector<8x16xf32>
      %200 = vector.broadcast %197 : vector<8x1xf32> to vector<8x16xf32>
      %201 = arith.mulf %199, %200 : vector<8x16xf32>
      %c0_123 = arith.constant 0 : index
      %c0_124 = arith.constant 0 : index
      %202 = vector.load %arg21[%c0_123, %c0_124] : memref<8x64xf32, #tpu.memory_space<vmem>>, vector<8x16xf32>
      tpu.vector_store %arg21[%c0_123, %c0_124], %201 {strides = array<i32>} : memref<8x64xf32, #tpu.memory_space<vmem>>, vector<8x16xf32>,
      %c1_125 = arith.constant 1 : index
      %c0_126 = arith.constant 0 : index
      %c0_127 = arith.constant 0 : index
      %203 = vector.load %arg19[%c1_125, %c0_126, %c0_127] : memref<4x8x1xf32, #tpu.memory_space<vmem>>, vector<1x8x1xf32>
      %204 = vector.shape_cast %203 : vector<1x8x1xf32> to vector<8x1xf32>
      %205 = tpu.reciprocal %204 {approx = true} : vector<8x1xf32> -> vector<8x1xf32>
      %c1_128 = arith.constant 1 : index
      %c0_129 = arith.constant 0 : index
      %c0_130 = arith.constant 0 : index
      %206 = vector.load %arg20[%c1_128, %c0_129, %c0_130] : memref<4x8x16xf32, #tpu.memory_space<vmem>>, vector<1x8x16xf32>
      %207 = vector.shape_cast %206 : vector<1x8x16xf32> to vector<8x16xf32>
      %208 = vector.broadcast %205 : vector<8x1xf32> to vector<8x16xf32>
      %209 = arith.mulf %207, %208 : vector<8x16xf32>
      %c0_131 = arith.constant 0 : index
      %c16 = arith.constant 16 : index
      %210 = vector.load %arg21[%c0_131, %c16] : memref<8x64xf32, #tpu.memory_space<vmem>>, vector<8x16xf32>
      tpu.vector_store %arg21[%c0_131, %c16], %209 {strides = array<i32>} : memref<8x64xf32, #tpu.memory_space<vmem>>, vector<8x16xf32>,
      %c2_132 = arith.constant 2 : index
      %c0_133 = arith.constant 0 : index
      %c0_134 = arith.constant 0 : index
      %211 = vector.load %arg19[%c2_132, %c0_133, %c0_134] : memref<4x8x1xf32, #tpu.memory_space<vmem>>, vector<1x8x1xf32>
      %212 = vector.shape_cast %211 : vector<1x8x1xf32> to vector<8x1xf32>
      %213 = tpu.reciprocal %212 {approx = true} : vector<8x1xf32> -> vector<8x1xf32>
      %c2_135 = arith.constant 2 : index
      %c0_136 = arith.constant 0 : index
      %c0_137 = arith.constant 0 : index
      %214 = vector.load %arg20[%c2_135, %c0_136, %c0_137] : memref<4x8x16xf32, #tpu.memory_space<vmem>>, vector<1x8x16xf32>
      %215 = vector.shape_cast %214 : vector<1x8x16xf32> to vector<8x16xf32>
      %216 = vector.broadcast %213 : vector<8x1xf32> to vector<8x16xf32>
      %217 = arith.mulf %215, %216 : vector<8x16xf32>
      %c0_138 = arith.constant 0 : index
      %c32 = arith.constant 32 : index
      %218 = vector.load %arg21[%c0_138, %c32] : memref<8x64xf32, #tpu.memory_space<vmem>>, vector<8x16xf32>
      tpu.vector_store %arg21[%c0_138, %c32], %217 {strides = array<i32>} : memref<8x64xf32, #tpu.memory_space<vmem>>, vector<8x16xf32>,
      %c3_139 = arith.constant 3 : index
      %c0_140 = arith.constant 0 : index
      %c0_141 = arith.constant 0 : index
      %219 = vector.load %arg19[%c3_139, %c0_140, %c0_141] : memref<4x8x1xf32, #tpu.memory_space<vmem>>, vector<1x8x1xf32>
      %220 = vector.shape_cast %219 : vector<1x8x1xf32> to vector<8x1xf32>
      %221 = tpu.reciprocal %220 {approx = true} : vector<8x1xf32> -> vector<8x1xf32>
      %c3_142 = arith.constant 3 : index
      %c0_143 = arith.constant 0 : index
      %c0_144 = arith.constant 0 : index
      %222 = vector.load %arg20[%c3_142, %c0_143, %c0_144] : memref<4x8x16xf32, #tpu.memory_space<vmem>>, vector<1x8x16xf32>
      %223 = vector.shape_cast %222 : vector<1x8x16xf32> to vector<8x16xf32>
      %224 = vector.broadcast %221 : vector<8x1xf32> to vector<8x16xf32>
      %225 = arith.mulf %223, %224 : vector<8x16xf32>
      %c0_145 = arith.constant 0 : index
      %c48 = arith.constant 48 : index
      %226 = vector.load %arg21[%c0_145, %c48] : memref<8x64xf32, #tpu.memory_space<vmem>>, vector<8x16xf32>
      tpu.vector_store %arg21[%c0_145, %c48], %225 {strides = array<i32>} : memref<8x64xf32, #tpu.memory_space<vmem>>, vector<8x16xf32>,
      %c0_146 = arith.constant 0 : index
      %c0_147 = arith.constant 0 : index
      %227 = vector.load %arg21[%c0_146, %c0_147] : memref<8x64xf32, #tpu.memory_space<vmem>>, vector<8x64xf32>
      %228 = arith.truncf %227 : vector<8x64xf32> to vector<8x64xbf16>
      %c0_148 = arith.constant 0 : index
      %c0_149 = arith.constant 0 : index
      %229 = vector.load %arg13[%c0_148, %c0_149] : memref<64x64xbf16, #tpu.memory_space<vmem>>, vector<64x64xbf16>
      %cst_150 = arith.constant dense<0.000000e+00> : vector<8x64xf32>
      %230 = tpu.matmul %228, %229, %cst_150 {dimension_numbers = #tpu.dot_dimension_numbers<[1], [0], [0], [1], [0, 0, 1, 1], [], []>} : vector<8x64xbf16>, vector<64x64xbf16>, vector<8x64xf32> -> vector<8x64xf32>
      %c0_151 = arith.constant 0 : index
      %c0_152 = arith.constant 0 : index
      %231 = vector.load %arg14[%c0_151, %c0_152] : memref<1x64xf32, #tpu.memory_space<vmem>>, vector<1x64xf32>
      %232 = vector.broadcast %231 : vector<1x64xf32> to vector<8x64xf32>
      %233 = arith.addf %230, %232 : vector<8x64xf32>
      %234 = arith.extf %4 : vector<8x64xbf16> to vector<8x64xf32>
      %235 = arith.addf %234, %233 : vector<8x64xf32>
      %cst_153 = arith.constant dense<0.000000e+00> : vector<8xf32>
      %236 = vector.multi_reduction <add>, %235, %cst_153 [1] : vector<8x64xf32> to vector<8xf32>
      %237 = vector.shape_cast %236 : vector<8xf32> to vector<8x1xf32>
      %cst_154 = arith.constant 6.400000e+01 : f32
      %238 = vector.broadcast %cst_154 : f32 to vector<8x1xf32>
      %239 = arith.divf %237, %238 : vector<8x1xf32>
      %240 = vector.broadcast %239 : vector<8x1xf32> to vector<8x64xf32>
      %241 = arith.subf %235, %240 : vector<8x64xf32>
      %242 = arith.mulf %241, %241 : vector<8x64xf32>
      %cst_155 = arith.constant dense<0.000000e+00> : vector<8xf32>
      %243 = vector.multi_reduction <add>, %242, %cst_155 [1] : vector<8x64xf32> to vector<8xf32>
      %244 = vector.shape_cast %243 : vector<8xf32> to vector<8x1xf32>
      %cst_156 = arith.constant 6.400000e+01 : f32
      %245 = vector.broadcast %cst_156 : f32 to vector<8x1xf32>
      %246 = arith.divf %244, %245 : vector<8x1xf32>
      %cst_157 = arith.constant 9.99999974E-6 : f32
      %247 = vector.broadcast %cst_157 : f32 to vector<8x1xf32>
      %248 = arith.addf %246, %247 : vector<8x1xf32>
      %249 = math.rsqrt %248 : vector<8x1xf32>
      %250 = vector.broadcast %249 : vector<8x1xf32> to vector<8x64xf32>
      %251 = arith.mulf %241, %250 : vector<8x64xf32>
      %c0_158 = arith.constant 0 : index
      %c0_159 = arith.constant 0 : index
      %252 = vector.load %arg15[%c0_158, %c0_159] : memref<1x64xf32, #tpu.memory_space<vmem>>, vector<1x64xf32>
      %253 = vector.broadcast %252 : vector<1x64xf32> to vector<8x64xf32>
      %254 = arith.mulf %251, %253 : vector<8x64xf32>
      %c0_160 = arith.constant 0 : index
      %c0_161 = arith.constant 0 : index
      %255 = vector.load %arg16[%c0_160, %c0_161] : memref<1x64xf32, #tpu.memory_space<vmem>>, vector<1x64xf32>
      %256 = vector.broadcast %255 : vector<1x64xf32> to vector<8x64xf32>
      %257 = arith.addf %254, %256 : vector<8x64xf32>
      %258 = arith.truncf %257 : vector<8x64xf32> to vector<8x64xbf16>
      %c0_162 = arith.constant 0 : index
      %c0_163 = arith.constant 0 : index
      %c0_164 = arith.constant 0 : index
      %259 = vector.load %arg17[%c0_162, %c0_163, %c0_164] : memref<1x8x64xbf16, #tpu.memory_space<vmem>>, vector<1x8x64xbf16>
      %260 = vector.shape_cast %259 : vector<1x8x64xbf16> to vector<8x64xbf16>
      %261 = vector.shape_cast %258 : vector<8x64xbf16> to vector<1x8x64xbf16>
      tpu.vector_store %arg17[%c0_162, %c0_163, %c0_164], %261 {strides = array<i32>} : memref<1x8x64xbf16, #tpu.memory_space<vmem>>, vector<1x8x64xbf16>,
    } else {
    }
    return
  }
  func.func @transform_0(%arg0: i32, %arg1: i32, %arg2: i32) -> (i32, i32, i32) {
    %c0_i32 = arith.constant 0 : i32
    %c0_i32_0 = arith.constant 0 : i32
    return %arg0, %arg1, %c0_i32 : i32, i32, i32
  }
  func.func @transform_1(%arg0: i32, %arg1: i32, %arg2: i32) -> (i32, i32, i32) {
    %c0_i32 = arith.constant 0 : i32
    %c0_i32_0 = arith.constant 0 : i32
    return %arg0, %arg1, %c0_i32 : i32, i32, i32
  }
  func.func @transform_2(%arg0: i32, %arg1: i32, %arg2: i32) -> (i32, i32, i32) {
    %c0_i32 = arith.constant 0 : i32
    %c0_i32_0 = arith.constant 0 : i32
    return %arg0, %arg2, %c0_i32 : i32, i32, i32
  }
  func.func @transform_3(%arg0: i32, %arg1: i32, %arg2: i32) -> (i32, i32, i32) {
    %c0_i32 = arith.constant 0 : i32
    %c0_i32_0 = arith.constant 0 : i32
    return %arg0, %arg2, %c0_i32 : i32, i32, i32
  }
  func.func @transform_4(%arg0: i32, %arg1: i32, %arg2: i32) -> (i32, i32) {
    %c0_i32 = arith.constant 0 : i32
    %c0_i32_0 = arith.constant 0 : i32
    %c0_i32_1 = arith.constant 0 : i32
    return %c0_i32, %c0_i32_0 : i32, i32
  }
  func.func @transform_5(%arg0: i32, %arg1: i32, %arg2: i32) -> (i32, i32) {
    %c0_i32 = arith.constant 0 : i32
    %c0_i32_0 = arith.constant 0 : i32
    %c0_i32_1 = arith.constant 0 : i32
    return %c0_i32, %c0_i32_0 : i32, i32
  }
  func.func @transform_6(%arg0: i32, %arg1: i32, %arg2: i32) -> (i32, i32) {
    %c0_i32 = arith.constant 0 : i32
    %c0_i32_0 = arith.constant 0 : i32
    %c0_i32_1 = arith.constant 0 : i32
    return %c0_i32, %c0_i32_0 : i32, i32
  }
  func.func @transform_7(%arg0: i32, %arg1: i32, %arg2: i32) -> (i32, i32) {
    %c0_i32 = arith.constant 0 : i32
    %c0_i32_0 = arith.constant 0 : i32
    %c0_i32_1 = arith.constant 0 : i32
    return %c0_i32, %c0_i32_0 : i32, i32
  }
  func.func @transform_8(%arg0: i32, %arg1: i32, %arg2: i32) -> (i32, i32) {
    %c0_i32 = arith.constant 0 : i32
    %c0_i32_0 = arith.constant 0 : i32
    %c0_i32_1 = arith.constant 0 : i32
    return %c0_i32, %c0_i32_0 : i32, i32
  }
  func.func @transform_9(%arg0: i32, %arg1: i32, %arg2: i32) -> (i32, i32) {
    %c0_i32 = arith.constant 0 : i32
    %c0_i32_0 = arith.constant 0 : i32
    %c0_i32_1 = arith.constant 0 : i32
    return %c0_i32, %c0_i32_0 : i32, i32
  }
  func.func @transform_10(%arg0: i32, %arg1: i32, %arg2: i32) -> (i32, i32) {
    %c0_i32 = arith.constant 0 : i32
    %c0_i32_0 = arith.constant 0 : i32
    %c0_i32_1 = arith.constant 0 : i32
    return %c0_i32, %c0_i32_0 : i32, i32
  }
  func.func @transform_11(%arg0: i32, %arg1: i32, %arg2: i32) -> (i32, i32) {
    %c0_i32 = arith.constant 0 : i32
    %c0_i32_0 = arith.constant 0 : i32
    %c0_i32_1 = arith.constant 0 : i32
    return %c0_i32, %c0_i32_0 : i32, i32
  }
  func.func @transform_12(%arg0: i32, %arg1: i32, %arg2: i32) -> (i32, i32) {
    %c0_i32 = arith.constant 0 : i32
    %c0_i32_0 = arith.constant 0 : i32
    %c0_i32_1 = arith.constant 0 : i32
    return %c0_i32, %c0_i32_0 : i32, i32
  }
  func.func @transform_13(%arg0: i32, %arg1: i32, %arg2: i32) -> (i32, i32) {
    %c0_i32 = arith.constant 0 : i32
    %c0_i32_0 = arith.constant 0 : i32
    %c0_i32_1 = arith.constant 0 : i32
    return %c0_i32, %c0_i32_0 : i32, i32
  }
  func.func @transform_14(%arg0: i32, %arg1: i32, %arg2: i32) -> (i32, i32, i32) {
    %c0_i32 = arith.constant 0 : i32
    %c0_i32_0 = arith.constant 0 : i32
    return %arg0, %arg1, %c0_i32 : i32, i32, i32
  }
}

</mosaic_0001>

<bundles_post_ra>
// kernel: tpu_custom_call.1
= control target key start
LH: loop header
LB: loop body
LE: loop exit
PB: predicated region body
PF: predicated region fallthrough
CT: control target
= control target key end

     0   :  { %6 = vsyncpa [#allocation3], 0  ;;  %s341_s0 = inlined_call_operand.hbm [shape: f32[8,128], index: 0, kind: input, shape index: {}]   ;;  %s342_s1 = inlined_call_operand.hbm [shape: f32[8,128], index: 1, kind: output, shape index: {}]  }
   0x1   :  { %7 = vsyncpa [#allocation4], 0  ;;  %s262_s6 = smov 0  }
   0x2 LB: > { %s145_s7 = sadd.s32 4294967295, %s248_s6   ;;  %p146_p0 = scmp.ge.s32.totalorder %s248_s6, 1  ;;  %s248_s6 = sphi %s262_s6, %s13_s6  }
   0x3   : > { %p60_p1 = scmp.lt.s32.totalorder %s248_s6, 3  ;;  %p276_p3 = scmp.eq.s32.totalorder %s145_s7, 0 }
   0x4   : > { %s250_s10 = smov [#allocation2]   ;;  %s180_s15 = scalar_lea.hbm %s341_s0, 128 }
   0x5   : > { %p270_p2 = pnand %p146_p0, %p60_p1  ;;  %s73_s11 = sshll.u32 %s250_s10, 4  ;;  %s74_s11 = int_to_ptr.vmem [resolvable:$true] %s73_s11 }
   0x6   : > { %s347_s9 = scalar_select %p276_p3, 1, 0 }
   0x7   : > { %s346_s8 = scalar_select %p270_p2, 1, 0 }
   0x8   : > { %p162_p4 = pneg %p270_p2  ;;  %p181_p6 = scmp.ne.s32.totalorder %s341_s0, %s180_s15 }
   0x9   : > { %p187_p10 = scmp.lt.u32.totalorder %s180_s15, %s341_s0 }
   0xa   : > { %p284_p5 = pnand %p276_p3, %p162_p4 }
   0xc   : > { %p182_p7 = pneg %p284_p5 }
   0xe   : > { %p183_p8 = pnand %p182_p7, %p181_p6 }
  0x10   : > { %p184_p9 = pneg %p183_p8 }
  0x12   : > { %p189_p11 = pnand %p187_p10, %p184_p9 }
  0x14   : > { %192 = shalt.err (!%p189_p11)
}
  0x15   : > { %s193_s20 = scalar_lea.vmem %s74_s11, 128  ;;  %p201_p1 = scmp.lt.s32.totalorder %s74_s11, %s74_s11 }
  0x16   : > { %p194_p12 = scmp.ne.s32.totalorder %s74_s11, %s193_s20  ;;  %p202_p4 = scmp.lt.s32.totalorder %s193_s20, %s193_s20 }
  0x18   : > { %p196_p13 = pnand %p194_p12, %p182_p7  ;;  %p203_p3 = por %p202_p4, %p201_p1 }
  0x1a   : > { %p197_p0 = pneg %p196_p13 }
  0x1c   : > { %p204_p2 = pnand %p203_p3, %p197_p0 }
  0x1e   : > { %207 = shalt.err (!%p204_p2)
}
  0x1f   : > { %165 = dma.hbm_to_vmem [thread:$0]  (!%p284_p5), %s341_s0, 128, %s74_s11, [#allocation3]  }
  0x20   : > { %p349_p6 = scmp.ne.s32.totalorder %s346_s8, 0 }
  0x21   : > { %p350_p8 = scmp.ne.s32.totalorder (!%p349_p6), %s347_s9, 0 }
  0x22   : > { %86 = sbr.rel (%p349_p6) target bundleno = 67 (0x43), region = 24 }
  0x29   : > { %239 = dma.done.wait (%p350_p8), [#allocation3], 128  }
  0x2a   : > { %241 = vsyncadd (%p350_p8), [#allocation3], 4294967168  ;;  %s251_s23 = smov [#allocation5]   ;;  %v96_v0 = vld [vmem:[#allocation2] sm:$0xff]  ;;  %p312_p2 = scmp.eq.s32.totalorder %s145_s7, 1 }
  0x2b   : > { %s106_s24 = sshll.u32 %s251_s23, 4  ;;  %v97_v1 = vadd.f32 1.0, %v96_v0  ;;  %s107_s24 = int_to_ptr.vmem [resolvable:$true] %s106_s24 }
  0x2c   : > { %s208_s26 = scalar_lea.vmem %s107_s24, 128  ;;  %p215_p9 = scmp.lt.s32.totalorder %s107_s24, %s107_s24 }
  0x2d   : > { %98 = vst [vmem:[#allocation5] sm:$0xff] %v97_v1  ;;  %p209_p3 = scmp.ne.s32.totalorder %s107_s24, %s208_s26  ;;  %p216_p10 = scmp.lt.s32.totalorder %s208_s26, %s208_s26 }
  0x2f   : > { %p210_p5 = pnand %p209_p3, %p312_p2  ;;  %p217_p11 = por %p216_p10, %p215_p9 }
  0x31   : > { %p211_p7 = pneg %p210_p5 }
  0x33   : > { %p218_p12 = pnand %p217_p11, %p211_p7 }
  0x35   : > { %221 = shalt.err (!%p218_p12)
}
  0x36   : > { %s222_s29 = scalar_lea.hbm %s342_s1, 128 }
  0x37   : > { %p223_p13 = scmp.ne.s32.totalorder %s342_s1, %s222_s29  ;;  %p228_p4 = scmp.lt.u32.totalorder %s222_s29, %s342_s1 }
  0x39   : > { %p224_p0 = pnand %p223_p13, %p312_p2 }
  0x3b   : > { %p225_p1 = pneg %p224_p0 }
  0x3d   : > { %p230_p6 = pnand %p228_p4, %p225_p1 }
  0x3f   : > { %233 = shalt.err (!%p230_p6)
}
  0x40   : > { %159 = dma.vmem_to_hbm [thread:$0]  (%p312_p2), %s107_s24, 128, %s342_s1, [#allocation4]  }
  0x41   : > { %243 = dma.done.wait (%p312_p2), [#allocation4], 128  }
  0x42   : > { %245 = vsyncadd (%p312_p2), [#allocation4], 4294967168 }
  0x43 PF: > { %s13_s6 = sadd.s32 1, %s248_s6  }
  0x44   : > { %p10_p8 = scmp.ge.s32.totalorder %s13_s6, 4  }
  0x46   :  { %12 = sbr.rel (!%p10_p8) target bundleno = 2 (0x2), region = 53 }
  0x4d   :  { %119 = vsyncpa [#allocation3], 1 }
  0x4e   :  { %121 = vsyncpa [#allocation3 + $0x1], 1 }
  0x4f   :  { %122 = vsyncpa [#allocation4], 1 }
  0x50   :  { %124 = vsyncpa [#allocation4 + $0x1], 1 }

// kernel: tpu_custom_call.1
= control target key start
LH: loop header
LB: loop body
LE: loop exit
PB: predicated region body
PF: predicated region fallthrough
CT: control target
= control target key end

     0   :  { %s3202_s0 = inlined_call_operand.hbm [shape: bf16[2,8,64], index: 0, kind: input, shape index: {}]   ;;  %s3203_s1 = inlined_call_operand.hbm [shape: bf16[2,8,64], index: 1, kind: input, shape index: {}]   ;;  %s3204_s2 = inlined_call_operand.hbm [shape: bf16[2,8,64], index: 2, kind: input, shape index: {}]   ;;  %s3205_s3 = inlined_call_operand.hbm [shape: bf16[2,8,64], index: 3, kind: input, shape index: {}]   ;;  %s3206_s4 = inlined_call_operand.hbm [shape: bf16[64,64], index: 4, kind: input, shape index: {}]   ;;  %s3207_s5 = inlined_call_operand.vmem [shape: f32[1,64], index: 5, kind: input, shape index: {}]   ;;  %s3208_s6 = inlined_call_operand.hbm [shape: bf16[64,64], index: 6, kind: input, shape index: {}]   ;;  %s3209_s7 = inlined_call_operand.vmem [shape: f32[1,64], index: 7, kind: input, shape index: {}]   ;;  %s3210_s8 = inlined_call_operand.hbm [shape: bf16[64,64], index: 8, kind: input, shape index: {}]   ;;  %s3211_s9 = inlined_call_operand.vmem [shape: f32[1,64], index: 9, kind: input, shape index: {}]   ;;  %s3212_s10 = inlined_call_operand.vmem [shape: bf16[64,64], index: 10, kind: input, shape index: {}]   ;;  %s3213_s11 = inlined_call_operand.vmem [shape: f32[1,64], index: 11, kind: input, shape index: {}]   ;;  %s3214_s12 = inlined_call_operand.vmem [shape: f32[1,64], index: 12, kind: input, shape index: {}]   ;;  %s3215_s13 = inlined_call_operand.vmem [shape: f32[1,64], index: 13, kind: input, shape index: {}]   ;;  %s3216_s14 = inlined_call_operand.hbm [shape: bf16[2,8,64], index: 14, kind: output, shape index: {}]  }
   0x1   :  { %3238 = sst [smem:[#allocation32_spill]] %s3202_s0 }
   0x2   :  { %3239 = sst [smem:[#allocation33_spill]] %s3203_s1 }
   0x3   :  { %3240 = sst [smem:[#allocation34_spill]] %s3206_s4 }
   0x4   :  { %3241 = sst [smem:[#allocation35_spill]] %s3208_s6 }
   0x5   :  { %3242 = sst [smem:[#allocation36_spill]] %s3211_s9 }
   0x6   :  { %3243 = sst [smem:[#allocation37_spill]] %s3212_s10 }
   0x7   :  { %3244 = sst [smem:[#allocation38_spill]] %s3213_s11 }
   0x8   :  { %3245 = sst [smem:[#allocation39_spill]] %s3214_s12 }
   0x9   :  { %3246 = sst [smem:[#allocation40_spill]] %s3215_s13 }
   0xa   :  { %3247 = sst [smem:[#allocation41_spill]] %s3216_s14 }
   0xb   :  { %19 = vsyncpa [#allocation7], 0 }
   0xc   :  { %21 = vsyncpa [#allocation7 + $0x1], 0 }
   0xd   :  { %22 = vsyncpa [#allocation10], 0 }
   0xe   :  { %24 = vsyncpa [#allocation10 + $0x1], 0 }
   0xf   :  { %25 = vsyncpa [#allocation13], 0 }
  0x10   :  { %27 = vsyncpa [#allocation13 + $0x1], 0 }
  0x11   :  { %28 = vsyncpa [#allocation16], 0 }
  0x12   :  { %29 = vsyncpa [#allocation8], 0 }
  0x13   :  { %31 = vsyncpa [#allocation8 + $0x1], 0  ;;  %s2613_s29 = smov 0   ;;  %s2615_s30 = smov 0  }
  0x14   :  { %s2617_s15 = smov 0   ;;  %s2619_s16 = smov 0  }
  0x15   :  { %s2621_s17 = smov 0   ;;  %s2623_s18 = smov 0  }
  0x16 LB: > { %3248 = sst [smem:[#allocation25_spill]] %s2496_s29  ;;  %s2644_s19 = sadd.s32 4294967295, %s2516_s18   ;;  %s2516_s18 = sphi %s2623_s18, %s37_s18   ;;  %s2512_s17 = sphi %s2621_s17, %s3298_s17   ;;  %s2508_s16 = sphi %s2619_s16, %s3297_s16   ;;  %s2504_s15 = sphi %s2617_s15, %s3301_s15   ;;  %s2500_s30 = sphi %s2615_s30, %s3300_s30   ;;  %s2496_s29 = sphi %s2613_s29, %s3299_s29  }
  0x17   : > { %3249 = sst [smem:[#allocation26_spill]] %s2508_s16  ;;  %s1857_s20 = sadd.s32 4294967294, %s2516_s18  }
  0x18   : > { %3250 = sst [smem:[#allocation27_spill]] %s2512_s17  ;;  %p78_p0 = scmp.ne.s32.totalorder %s2500_s30, %s2496_s29 }
  0x19   : > { %p3220_p1 = scmp.eq.s32.totalorder %s2644_s19, 0  ;;  %p404_p3 = scmp.eq.s32.totalorder %s1857_s20, 1 }
  0x1a   : > { %p1858_p5 = scmp.ge.s32.totalorder %s2516_s18, 1  ;;  %p411_p7 = scmp.lt.s32.totalorder %s2516_s18, 3 }
  0x1b   : > { %p2653_p4 = por %p3220_p1, %p78_p0  ;;  %p2658_p6 = por %p404_p3, %p78_p0 }
  0x1c   : > { %p2663_p8 = pnand %p1858_p5, %p411_p7  ;;  %s2518_s24 = smov [#allocation14]  }
  0x1d   : > { %s3251_s21 = scalar_select %p2653_p4, 1, 0 }
  0x1e   : > { %s3252_s22 = scalar_select %p2658_p6, 1, 0 }
  0x1f   : > { %s3254_s23 = scalar_select %p2663_p8, 1, 0 }
  0x20   : > { %3253 = sst [smem:[#allocation28_spill]] %s3252_s22  ;;  %s423_s25 = sshll.u32 %s2518_s24, 4  ;;  %s2667_s25 = int_to_ptr.vmem [resolvable:$true] %s423_s25 }
  0x21   : > { %p2072_p9 = pneg %p2663_p8  ;;  %s2519_s27 = smov [#allocation15]  }
  0x22   : > { %s439_s28 = sshll.u32 %s2519_s27, 4  ;;  %s3256_s4 = sld [smem:[#allocation34_spill]]  ;;  %s2678_s28 = int_to_ptr.vmem [resolvable:$true] %s439_s28 }
  0x23   : > { %p2674_p11 = pnand %p2072_p9, %p3220_p1 }
  0x25   : > { %s3255_s26 = scalar_select %p2674_p11, 1, 0 }
  0x26   : > { %p2688_p13 = pneg %p2674_p11 }
  0x28   : > { %s2214_s29 = scalar_lea.hbm %s3256_s4, 512 }
  0x29   : > { %p2215_p12 = scmp.ne.s32.totalorder %s3256_s4, %s2214_s29  ;;  %p2221_p5 = scmp.lt.u32.totalorder %s2214_s29, %s3256_s4 }
  0x2a   : > { %s3257_s13 = scalar_select %p2688_p13, 1, 0 }
  0x2b   : > { %p2217_p0 = pnand %p2688_p13, %p2215_p12 }
  0x2d   : > { %p2218_p3 = pneg %p2217_p0 }
  0x2f   : > { %p2223_p7 = pnand %p2221_p5, %p2218_p3 }
  0x31   : > { %2226 = shalt.err (!%p2223_p7)
}
  0x32   : > { %s2227_s14 = scalar_lea.vmem %s2667_s25, 512  ;;  %p2235_p2 = scmp.lt.s32.totalorder %s2667_s25, %s2667_s25 }
  0x33   : > { %p2228_p9 = scmp.ne.s32.totalorder %s2667_s25, %s2227_s14  ;;  %p2236_p6 = scmp.lt.s32.totalorder %s2227_s14, %s2227_s14 }
  0x35   : > { %p2230_p10 = pnand %p2228_p9, %p2688_p13  ;;  %p2237_p12 = por %p2236_p6, %p2235_p2 }
  0x37   : > { %p2231_p1 = pneg %p2230_p10 }
  0x39   : > { %p2238_p0 = pnand %p2237_p12, %p2231_p1 }
  0x3b   : > { %2241 = shalt.err (!%p2238_p0)
}
  0x3c   : > { %s3222_s22 = smov 64   ;;  %s3223_s12 = smov 4  }
  0x3d   : > { %2075 = dma.hbm_to_vmem [thread:$0]  (!%p2674_p11), %s3256_s4, 512, %s2667_s25, [#allocation13], %s3222_s22, %s3222_s22, %s3223_s12  }
  0x3e   : > { %s3258_s6 = sld [smem:[#allocation35_spill]] }
  0x44   : > { %s2242_s14 = scalar_lea.hbm %s3258_s6, 512 }
  0x45   : > { %p2243_p1 = scmp.ne.s32.totalorder %s3258_s6, %s2242_s14  ;;  %p2249_p10 = scmp.lt.u32.totalorder %s2242_s14, %s3258_s6 }
  0x47   : > { %p2245_p2 = pnand %p2243_p1, %p2688_p13 }
  0x49   : > { %p2246_p6 = pneg %p2245_p2 }
  0x4b   : > { %p2251_p3 = pnand %p2249_p10, %p2246_p6 }
  0x4d   : > { %2254 = shalt.err (!%p2251_p3)
}
  0x4e   : > { %s2255_s25 = scalar_lea.vmem %s2678_s28, 512  ;;  %p2263_p12 = scmp.lt.s32.totalorder %s2678_s28, %s2678_s28 }
  0x4f   : > { %p2256_p5 = scmp.ne.s32.totalorder %s2678_s28, %s2255_s25  ;;  %p2264_p0 = scmp.lt.s32.totalorder %s2255_s25, %s2255_s25 }
  0x51   : > { %p2258_p7 = pnand %p2256_p5, %p2688_p13  ;;  %p2265_p1 = por %p2264_p0, %p2263_p12 }
  0x53   : > { %p2259_p9 = pneg %p2258_p7 }
  0x55   : > { %p2266_p2 = pnand %p2265_p1, %p2259_p9 }
  0x57   : > { %2269 = shalt.err (!%p2266_p2)
}
  0x58   : > { %2078 = dma.hbm_to_vmem [thread:$0]  (!%p2674_p11), %s3258_s6, 512, %s2678_s28, [#allocation16], %s3222_s22, %s3222_s22, %s3223_s12  }
  0x59   : > { %s56_s11 = sadd.s32 1, %s2512_s17  ;;  %s65_s16 = sadd.s32 1, %s2504_s15 }
  0x5a   : > { %p58_p6 = scmp.ge.s32.totalorder %s56_s11, 2  ;;  %p72_p10 = scmp.ne.s32.totalorder %s2504_s15, %s2500_s30 }
  0x5b   : > { %p73_p3 = scmp.eq.s32.totalorder %s2516_s18, 0  ;;  %p2102_p5 = scmp.lt.s32.totalorder %s2516_s18, 2 }
  0x5c   : > { %s3303_s11 = smov (%p58_p6, %s56_s11), 0  ;;  %p3260_p9 = scmp.eq.s32.totalorder %s2644_s19, 1 }
  0x5d   : > { %3259 = sst [smem:[#allocation29_spill]] %s3303_s11  ;;  %p74_p7 = por %p73_p3, %p72_p10 }
  0x5e   : > { %p2748_p12 = por %p3260_p9, %p72_p10  ;;  %s60_s20 = ssub.s32 %s2512_s17, %s3303_s11 }
  0x5f   : > { %s3224_s28 = sand.u32 1, %s2504_s15   ;;  %p63_p0 = scmp.eq.s32.totalorder %s60_s20, 0 }
  0x60   : > { %s3261_s29 = scalar_select %p2748_p12, 1, 0 }
  0x61   : > { %s2757_s24 = sshll.u32 %s3224_s28, 2  ;;  %s2760_s27 = sshll.u32 %s2512_s17, 6 }
  0x62   : > { %3262 = sst [smem:[#allocation30_spill]] %s3261_s29  ;;  %p2762_p1 = pnand %p2102_p5, %p74_p7 }
  0x63   : > { %s2767_s25 = scalar_select %p63_p0, %s2504_s15, %s65_s16  }
  0x64   : > { %s3263_s14 = scalar_select %p2762_p1, 1, 0 }
  0x65   : > { %3264 = sst [smem:[#allocation31_spill]] %s2767_s25  ;;  %s3229_s9 = sand.u32 1, %s2516_s18  }
  0x66   : > { %s3265_s1 = sld [smem:[#allocation33_spill]]  ;;  %s507_s20 = scalar_lea.vmem [#allocation9], %s2757_s24 }
  0x67   : > { %s515_s28 = sshll.u32 %s507_s20, 4  ;;  %s2781_s4 = scalar_lea.sflag [#allocation10], %s3229_s9  ;;  %s2777_s28 = int_to_ptr.vmem [resolvable:$true] %s515_s28 }
  0x68   : > { %p2787_p6 = pneg %p2762_p1 }
  0x6c   : > { %s2774_s12 = scalar_lea.hbm %s3265_s1, %s2760_s27  ;;  %s2275_s20 = scalar_lea.hbm %s3265_s1, 128 }
  0x6d   : > { %s2270_s6 = scalar_lea.hbm %s2774_s12, 64  ;;  %p2276_p5 = scmp.lt.u32.totalorder %s2774_s12, %s3265_s1 }
  0x6e   : > { %p2271_p2 = scmp.ne.s32.totalorder %s2774_s12, %s2270_s6  ;;  %p2277_p7 = scmp.lt.u32.totalorder %s2275_s20, %s2270_s6 }
  0x6f   : > { %p2279_p0 = scmp.lt.u32.totalorder %s2270_s6, %s2774_s12 }
  0x70   : > { %p2273_p10 = pnand %p2787_p6, %p2271_p2  ;;  %p2278_p9 = por %p2277_p7, %p2276_p5 }
  0x72   : > { %p2274_p3 = pneg %p2273_p10  ;;  %p2280_p12 = por %p2279_p0, %p2278_p9 }
  0x74   : > { %p2281_p4 = pnand %p2280_p12, %p2274_p3 }
  0x76   : > { %2284 = shalt.err (!%p2281_p4)
}
  0x77   : > { %s2285_s9 = scalar_lea.vmem %s2777_s28, 64  ;;  %s2522_s22 = smov [#allocation9]  }
  0x78   : > { %p2286_p2 = scmp.ne.s32.totalorder %s2777_s28, %s2285_s9  ;;  %s2290_s10 = sshll.u32 %s2522_s22, 4  ;;  %s2291_s10 = int_to_ptr.vmem [resolvable:$false] %s2290_s10 }
  0x79   : > { %s2292_s17 = scalar_lea.vmem %s2291_s10, 128  ;;  %p2293_p11 = scmp.lt.s32.totalorder %s2777_s28, %s2291_s10 }
  0x7a   : > { %p2288_p10 = pnand %p2286_p2, %p2787_p6  ;;  %p2294_p13 = scmp.lt.s32.totalorder %s2292_s17, %s2285_s9 }
  0x7c   : > { %p2289_p8 = pneg %p2288_p10  ;;  %p2295_p5 = por %p2294_p13, %p2293_p11 }
  0x7e   : > { %p2296_p7 = pnand %p2295_p5, %p2289_p8 }
  0x80   : > { %2299 = shalt.err (!%p2296_p7)
}
  0x81   : > { %2088 = dma.hbm_to_vmem [thread:$0]  (!%p2762_p1), %s2774_s12, 64, %s2777_s28, %s2781_s4  }
  0x82   : > { %s2523_s6 = smov [#allocation17]   ;;  %s3267_s0 = sld [smem:[#allocation32_spill]] }
  0x83   : > { %s455_s11 = sshll.u32 %s2523_s6, 4  ;;  %s2300_s17 = scalar_lea.hbm %s3210_s8, 512  ;;  %s456_s11 = int_to_ptr.vmem [resolvable:$true] %s455_s11 }
  0x84   : > { %p2301_p4 = scmp.ne.s32.totalorder %s3210_s8, %s2300_s17  ;;  %p3268_p8 = scmp.ne.s32.totalorder %s3257_s13, 0 }
  0x85   : > { %p2307_p12 = scmp.lt.u32.totalorder %s2300_s17, %s3210_s8 }
  0x86   : > { %p2303_p11 = pnand %p2301_p4, %p3268_p8 }
  0x88   : > { %s2815_s1 = scalar_lea.hbm %s3267_s0, %s2760_s27  ;;  %p2304_p13 = pneg %p2303_p11 }
  0x8a   : > { %p2309_p3 = pnand %p2307_p12, %p2304_p13 }
  0x8c   : > { %2312 = shalt.err (!%p2309_p3)
}
  0x8d   : > { %s2313_s6 = scalar_lea.vmem %s456_s11, 512  ;;  %p2321_p10 = scmp.lt.s32.totalorder %s456_s11, %s456_s11 }
  0x8e   : > { %p2314_p9 = scmp.ne.s32.totalorder %s456_s11, %s2313_s6  ;;  %p2322_p5 = scmp.lt.s32.totalorder %s2313_s6, %s2313_s6 }
  0x90   : > { %p2316_p0 = pnand %p2314_p9, %p3268_p8  ;;  %p2323_p7 = por %p2322_p5, %p2321_p10 }
  0x92   : > { %p2317_p2 = pneg %p2316_p0 }
  0x94   : > { %p2324_p1 = pnand %p2323_p7, %p2317_p2 }
  0x96   : > { %2327 = shalt.err (!%p2324_p1)
}
  0x97   : > { %p3269_p4 = scmp.ne.s32.totalorder %s3255_s26, 0  ;;  %s3270_s29 = smov 4  }
  0x98   : > { %s3271_s25 = smov 64   ;;  %s488_s13 = scalar_lea.vmem [#allocation6], %s2757_s24 }
  0x99   : > { %2081 = dma.hbm_to_vmem [thread:$0]  (!%p3269_p4), %s3210_s8, 512, %s456_s11, [#allocation16], %s3271_s25, %s3271_s25, %s3270_s29  }
  0x9a   : > { %s496_s9 = sshll.u32 %s488_s13, 4  ;;  %s2845_s17 = scalar_lea.hbm %s3204_s2, %s2760_s27  ;;  %s2839_s9 = int_to_ptr.vmem [resolvable:$true] %s496_s9 }
  0x9b   : > { %s3272_s12 = sand.u32 1, %s2504_s15   ;;  %s2328_s6 = scalar_lea.hbm %s2815_s1, 64 }
  0x9c   : > { %s485_s28 = scalar_lea.sflag [#allocation7], %s3272_s12  ;;  %p2329_p1 = scmp.ne.s32.totalorder %s2815_s1, %s2328_s6 }
  0x9d   : > { %s2333_s11 = scalar_lea.hbm %s3267_s0, 128  ;;  %p2334_p13 = scmp.lt.u32.totalorder %s2815_s1, %s3267_s0 }
  0x9e   : > { %p2331_p8 = pnand %p2329_p1, %p2787_p6  ;;  %p2335_p12 = scmp.lt.u32.totalorder %s2333_s11, %s2328_s6 }
  0x9f   : > { %p2337_p9 = scmp.lt.u32.totalorder %s2328_s6, %s2815_s1 }
  0xa0   : > { %p2332_p11 = pneg %p2331_p8  ;;  %p2336_p3 = por %p2335_p12, %p2334_p13 }
  0xa2   : > { %p2338_p0 = por %p2337_p9, %p2336_p3 }
  0xa4   : > { %p2339_p2 = pnand %p2338_p0, %p2332_p11 }
  0xa6   : > { %2342 = shalt.err (!%p2339_p2)
}
  0xa7   : > { %s2343_s13 = scalar_lea.vmem %s2839_s9, 64  ;;  %s2524_s26 = smov [#allocation6]  }
  0xa8   : > { %p2344_p10 = scmp.ne.s32.totalorder %s2839_s9, %s2343_s13  ;;  %s2348_s10 = sshll.u32 %s2524_s26, 4  ;;  %s2349_s10 = int_to_ptr.vmem [resolvable:$false] %s2348_s10 }
  0xa9   : > { %s2350_s12 = scalar_lea.vmem %s2349_s10, 128  ;;  %p2351_p4 = scmp.lt.s32.totalorder %s2839_s9, %s2349_s10 }
  0xaa   : > { %p2346_p5 = pnand %p2344_p10, %p2787_p6  ;;  %p2352_p1 = scmp.lt.s32.totalorder %s2350_s12, %s2343_s13 }
  0xac   : > { %p2347_p7 = pneg %p2346_p5  ;;  %p2353_p8 = por %p2352_p1, %p2351_p4 }
  0xae   : > { %p2354_p13 = pnand %p2353_p8, %p2347_p7 }
  0xb0   : > { %2357 = shalt.err (!%p2354_p13)
}
  0xb1   : > { %p3273_p11 = scmp.ne.s32.totalorder %s3263_s14, 0  ;;  %s526_s6 = scalar_lea.vmem [#allocation11], %s2757_s24 }
  0xb2   : > { %s534_s20 = sshll.u32 %s526_s6, 4  ;;  %s2875_s29 = scalar_lea.hbm %s3205_s3, %s2760_s27  ;;  %s535_s20 = int_to_ptr.vmem [resolvable:$true] %s534_s20 }
  0xb3   : > { %2085 = dma.hbm_to_vmem [thread:$0]  (!%p3273_p11), %s2815_s1, 64, %s2839_s9, %s485_s28  }
  0xb4   : > { %s2358_s25 = scalar_lea.hbm %s2845_s17, 64  ;;  %s2363_s10 = scalar_lea.hbm %s3204_s2, 128 }
  0xb5   : > { %p2359_p12 = scmp.ne.s32.totalorder %s2845_s17, %s2358_s25  ;;  %p2364_p0 = scmp.lt.u32.totalorder %s2845_s17, %s3204_s2 }
  0xb6   : > { %p2365_p2 = scmp.lt.u32.totalorder %s2363_s10, %s2358_s25  ;;  %p2367_p5 = scmp.lt.u32.totalorder %s2358_s25, %s2845_s17 }
  0xb7   : > { %p2361_p3 = pnand %p2359_p12, %p2787_p6 }
  0xb8   : > { %p2366_p10 = por %p2365_p2, %p2364_p0 }
  0xb9   : > { %p2362_p9 = pneg %p2361_p3 }
  0xba   : > { %p2368_p7 = por %p2367_p5, %p2366_p10 }
  0xbc   : > { %p2369_p4 = pnand %p2368_p7, %p2362_p9 }
  0xbe   : > { %2372 = shalt.err (!%p2369_p4)
}
  0xbf   : > { %s2373_s1 = scalar_lea.vmem %s535_s20, 64  ;;  %s2525_s27 = smov [#allocation11]  }
  0xc0   : > { %p2374_p1 = scmp.ne.s32.totalorder %s535_s20, %s2373_s1  ;;  %s2378_s9 = sshll.u32 %s2525_s27, 4  ;;  %s2379_s9 = int_to_ptr.vmem [resolvable:$false] %s2378_s9 }
  0xc1   : > { %s2380_s28 = scalar_lea.vmem %s2379_s9, 128  ;;  %p2381_p12 = scmp.lt.s32.totalorder %s535_s20, %s2379_s9 }
  0xc2   : > { %p2376_p8 = pnand %p2374_p1, %p2787_p6  ;;  %p2382_p3 = scmp.lt.s32.totalorder %s2380_s28, %s2373_s1 }
  0xc4   : > { %p2377_p13 = pneg %p2376_p8  ;;  %p2383_p11 = por %p2382_p3, %p2381_p12 }
  0xc6   : > { %p2384_p0 = pnand %p2383_p11, %p2377_p13 }
  0xc8   : > { %2387 = shalt.err (!%p2384_p0)
}
  0xc9   : > { %p3274_p2 = scmp.ne.s32.totalorder %s3263_s14, 0  ;;  %s545_s0 = scalar_lea.vmem [#allocation12], %s2757_s24 }
  0xca   : > { %s553_s6 = sshll.u32 %s545_s0, 4  ;;  %s3275_s22 = sand.u32 1, %s2516_s18   ;;  %s554_s6 = int_to_ptr.vmem [resolvable:$true] %s553_s6 }
  0xcb   : > { %2091 = dma.hbm_to_vmem [thread:$0]  (!%p3274_p2), %s2845_s17, 64, %s535_s20, %s2781_s4  }
  0xcc   : > { %s542_s11 = scalar_lea.sflag [#allocation13], %s3275_s22  ;;  %s2388_s25 = scalar_lea.hbm %s2875_s29, 64 }
  0xcd   : > { %p2389_p11 = scmp.ne.s32.totalorder %s2875_s29, %s2388_s25  ;;  %s2393_s10 = scalar_lea.hbm %s3205_s3, 128 }
  0xce   : > { %p2394_p5 = scmp.lt.u32.totalorder %s2875_s29, %s3205_s3  ;;  %p2395_p7 = scmp.lt.u32.totalorder %s2393_s10, %s2388_s25 }
  0xcf   : > { %p2391_p9 = pnand %p2389_p11, %p2787_p6  ;;  %p2397_p1 = scmp.lt.u32.totalorder %s2388_s25, %s2875_s29 }
  0xd0   : > { %p2396_p4 = por %p2395_p7, %p2394_p5 }
  0xd1   : > { %p2392_p10 = pneg %p2391_p9 }
  0xd2   : > { %p2398_p8 = por %p2397_p1, %p2396_p4 }
  0xd4   : > { %p2399_p13 = pnand %p2398_p8, %p2392_p10 }
  0xd6   : > { %2402 = shalt.err (!%p2399_p13)
}
  0xd7   : > { %s2403_s4 = scalar_lea.vmem %s554_s6, 64  ;;  %s2526_s24 = smov [#allocation12]  }
  0xd8   : > { %p2404_p12 = scmp.ne.s32.totalorder %s554_s6, %s2403_s4  ;;  %s2408_s17 = sshll.u32 %s2526_s24, 4  ;;  %s2409_s17 = int_to_ptr.vmem [resolvable:$false] %s2408_s17 }
  0xd9   : > { %s2410_s20 = scalar_lea.vmem %s2409_s17, 128  ;;  %p2411_p11 = scmp.lt.s32.totalorder %s554_s6, %s2409_s17 }
  0xda   : > { %p2406_p3 = pnand %p2404_p12, %p2787_p6  ;;  %p2412_p9 = scmp.lt.s32.totalorder %s2410_s20, %s2403_s4 }
  0xdc   : > { %p2407_p0 = pneg %p2406_p3  ;;  %p2413_p2 = por %p2412_p9, %p2411_p11 }
  0xde   : > { %p2414_p5 = pnand %p2413_p2, %p2407_p0 }
  0xe0   : > { %2417 = shalt.err (!%p2414_p5)
}
  0xe1   : > { %p3276_p7 = scmp.ne.s32.totalorder %s3263_s14, 0  ;;  %p3277_p10 = scmp.ne.s32.totalorder %s3254_s23, 0 }
  0xe2   : > { %s2918_s16 = sand.u32 (!%p3277_p10), 1, %s2500_s30   ;;  %p3278_p6 = scmp.ne.s32.totalorder (!%p3277_p10), %s3251_s21, 0 }
  0xe3   : > { %2094 = dma.hbm_to_vmem [thread:$0]  (!%p3276_p7), %s2875_s29, 64, %s554_s6, %s542_s11  }
  0xe4   : > { %562 = sbr.rel (%p3277_p10) target bundleno = 2472 (0x9a8), region = 76  ;;  %s2921_s27 = sshll.u32 (!%p3277_p10), %s2918_s16, 2 }
  0xe5   : > { %s565_s9 = scalar_lea.sflag (!%p3277_p10), [#allocation7], %s2918_s16  ;;  %s568_s28 = scalar_lea.vmem (!%p3277_p10), [#allocation6], %s2921_s27 }
  0xeb   : > { %2471 = dma.done.wait (%p3278_p6), %s565_s9, 64  }
  0xec   : > { %2473 = vsyncadd (%p3278_p6), %s565_s9, 4294967232  ;;  %s573_s23 = sand.u32 1, %s2644_s19   ;;  %s577_s29 = scalar_lea.vmem [#allocation9], %s2921_s27 }
  0xed   : > { %s574_s14 = scalar_lea.sflag [#allocation10], %s573_s23 }
  0xee   : > { %2475 = dma.done.wait (%p3278_p6), %s574_s14, 128  }
  0xef   : > { %2477 = vsyncadd (%p3278_p6), %s574_s14, 4294967168  ;;  %s586_s0 = scalar_lea.vmem [#allocation11], %s2921_s27  ;;  %s592_s6 = scalar_lea.sflag [#allocation13], %s573_s23 }
  0xf0   : > { %s595_s22 = scalar_lea.vmem [#allocation12], %s2921_s27 }
  0xf1   : > { %2479 = dma.done.wait (%p3278_p6), %s592_s6, 64  }
  0xf2   : > { %2481 = vsyncadd (%p3278_p6), %s592_s6, 4294967232  ;;  %p3279_p2 = scmp.eq.s32.totalorder %s2644_s19, 0 }
  0xf4   : > { %2483 = dma.done.wait (%p3279_p2), [#allocation13], 512   ;;  %p3280_p4 = pmov %p3279_p2 }
  0xf5   : > { %p3281_p1 = pmov %p3279_p2 }
  0xf6   : > { %2485 = vsyncadd (%p3280_p4), [#allocation13], 4294966784 }
  0xf7   : > { %2487 = dma.done.wait (%p3281_p1), [#allocation16], 1024   ;;  %p3282_p8 = pmov %p3281_p1 }
  0xf8   : > { %v2527_v0 = vmov 0.0   ;;  %vm2528_vm0 = vmmov 0   ;;  %v2172_v1 = vld [vmem:[#allocation15] sm:$0xff]   ;;  %v2174_v3 = vld [vmem:[#allocation15 + $0x8] sm:$0xff]   ;;  %v2176_v5 = vld [vmem:[#allocation15 + $0x10] sm:$0xff]   ;;  %vm731_vm1 = vcmask 523264  }
  0xf9   : > { %2489 = vsyncadd (%p3282_p8), [#allocation16], 4294966272  ;;  %1966 = vmatprep.subr.bf16.mxu1 %v2527_v0  ;;  %1954 = vmatprep.subr.bf16.mxu0 %v2527_v0  ;;  %v2173_v2 = vld [vmem:[#allocation14] sm:$0xff]   ;;  %v2175_v4 = vld [vmem:[#allocation14 + $0x8] sm:$0xff]   ;;  %vm681_vm2 = vcmask 130048   ;;  %s2529_s13 = smov 112  }
  0xfa   : > { %1974 = vmatprep.mubr.msk.bf16.mxu1 %vm2528_vm0, %v2527_v0  ;;  %1962 = vmatprep.mubr.msk.bf16.mxu0 %vm2528_vm0, %v2527_v0  ;;  %v2177_v6 = vld [vmem:[#allocation14 + $0x10] sm:$0xff]   ;;  %v2178_v7 = vld [vmem:[#allocation15 + $0x18] sm:$0xff]   ;;  %v2965_v11 = vld [vmem:[%s568_s28] sm:$0xf]  ;;  %682 = vst.msk [vmem:[#allocation4] sm:$0xff] %vm681_vm2, %v2527_v0  ;;  %s2530_s26 = smov 96  }
  0xfb   : > { %1967 = vmatpush3.bf16.msra.mxu1 %v2172_v1  ;;  %1955 = vmatpush3.bf16.msra.mxu0 %v2173_v2  ;;  %v689_v8 = vld [vmem:[%s586_s0] sm:$0xf]  ;;  %v690_v9 = vld [vmem:[%s595_s22] sm:$0xf]  ;;  %v687_v12 = vld [vmem:[%s577_s29] sm:$0xf] }
  0xfc   : > { %1968 = vmatprep.subr.bf16.mxu1 %v2527_v0  ;;  %1956 = vmatprep.subr.bf16.mxu0 %v2527_v0  ;;  %v2179_v10 = vld [vmem:[#allocation14 + $0x18] sm:$0xff]   ;;  %v691_v13 = vadd.bf16 %v690_v9, %v689_v8  ;;  %v688_v14 = vadd.bf16 %v687_v12, %v2965_v11  ;;  %683 = vst.msk [vmem:[#allocation4 + $0x8] sm:$0xff] %vm681_vm2, %v2527_v0  ;;  %684 = vst.msk [vmem:[#allocation4 + $0x10] sm:$0xff] %vm681_vm2, %v2527_v0  ;;  %v2180_v15 = vld [vmem:[#allocation17] sm:$0xff]   ;;  %s2531_s10 = smov 80   ;;  %vm991_vm3 = vcmask 64512  }
  0xfd   : > { %685 = vst.msk [vmem:[#allocation4 + $0x18] sm:$0xff] %vm681_vm2, %v2527_v0  ;;  %v2181_v16 = vld [vmem:[#allocation17 + $0x8] sm:$0xff]   ;;  %v2182_v17 = vld [vmem:[#allocation17 + $0x10] sm:$0xff]   ;;  %v2183_v18 = vld [vmem:[#allocation17 + $0x18] sm:$0xff]   ;;  %vm672_vm4 = vcmask 7168   ;;  %v2532_v52 = vmov -inf  }
  0xfe   : > { %v1886_v19 = vld [vmem:[%s3209_s7] ss:$0 sm:$0xff]  ;;  %673 = vst.msk [vmem:[#allocation2] sm:$0xff] %vm672_vm4, %v2532_v52  ;;  %674 = vst.msk [vmem:[#allocation2 + $0x8] sm:$0xff] %vm672_vm4, %v2532_v52  ;;  %v2533_v53 = vmov 0   ;;  %s3283_s4 = sld [smem:[#allocation36_spill]] }
  0xff   : > { %1969 = vmatpush3.bf16.msra.mxu1 %v2174_v3  ;;  %1957 = vmatpush3.bf16.msra.mxu0 %v2175_v4  ;;  %v1880_v20 = vld [vmem:[%s3207_s5] ss:$0 sm:$0xff]  ;;  %675 = vst.msk [vmem:[#allocation2 + $0x10] sm:$0xff] %vm672_vm4, %v2532_v52  ;;  %676 = vst.msk [vmem:[#allocation2 + $0x18] sm:$0xff] %vm672_vm4, %v2532_v52  ;;  %vm1026_vm5 = vcmask 1043456   ;;  %s3284_s20 = sld [smem:[#allocation37_spill]] }
 0x100   : > { %1970 = vmatprep.subr.bf16.mxu1 %v2527_v0  ;;  %1958 = vmatprep.subr.bf16.mxu0 %v2527_v0  ;;  %677 = vst.msk [vmem:[#allocation3] sm:$0xff] %vm672_vm4, %v2527_v0  ;;  %678 = vst.msk [vmem:[#allocation3 + $0x8] sm:$0xff] %vm672_vm4, %v2527_v0  ;;  %s2534_s9 = smov 32   ;;  %s2535_s22 = smov 16   ;;  %vm1510_vm6 = vcmask 261248   ;;  %vm1525_vm7 = vcmask 392448  }
 0x101   : > { %679 = vst.msk [vmem:[#allocation3 + $0x10] sm:$0xff] %vm672_vm4, %v2527_v0  ;;  %680 = vst.msk [vmem:[#allocation3 + $0x18] sm:$0xff] %vm672_vm4, %v2527_v0  ;;  %2170 = vset.pattern.permute.xlu0 %v2533_v53  ;;  %2171 = vset.pattern.permute.xlu1 %v2533_v53  ;;  %s2536_s19 = smov 48   ;;  %vm1540_vm8 = vcmask 523648   ;;  %s3285_s25 = sld [smem:[#allocation38_spill]]  ;;  %vm1659_vm9 = vcmask 519168  }
 0x102   : > { %s3287_s12 = sld [smem:[#allocation39_spill]]  ;;  %s3288_s1 = sld [smem:[#allocation30_spill]] }
 0x103   : > { %1971 = vmatpush3.bf16.msra.mxu1 %v2176_v5  ;;  %1959 = vmatpush3.bf16.msra.mxu0 %v2177_v6  ;;  %s3289_s17 = sld [smem:[#allocation40_spill]]  ;;  %s666_s28 = scalar_lea.vmem [#allocation18], %s2921_s27 }
 0x104   : > { %1972 = vmatprep.subr.bf16.mxu1 %v2527_v0  ;;  %1960 = vmatprep.subr.bf16.mxu0 %v2527_v0  ;;  %v1892_v62 = vld [vmem:[%s3283_s4] ss:$0 sm:$0xff]  ;;  %s1676_s23 = sshll.u32 %s666_s28, 4  ;;  %s3290_s0 = sld [smem:[#allocation41_spill]]  ;;  %s3155_s23 = int_to_ptr.vmem [resolvable:$true] %s1676_s23 }
 0x105   : > { %v3042_v63 = vld [vmem:[#allocation2] sm:$0xff]  ;;  %s2537_s27 = smov [#allocation18]  }
 0x106   : > { %s2422_s21 = sshll.u32 %s2537_s27, 4  ;;  %s2423_s21 = int_to_ptr.vmem [resolvable:$false] %s2422_s21 }
 0x107   : > { %1973 = vmatpush3.bf16.msra.mxu1 %v2178_v7  ;;  %1961 = vmatpush3.bf16.msra.mxu0 %v2179_v10  ;;  %s2424_s11 = scalar_lea.vmem %s2423_s21, 128  ;;  %p2425_p11 = scmp.lt.s32.totalorder %s3155_s23, %s2423_s21 }
 0x108   : > { %1990 = vmatprep.subr.bf16.mxu1 %v2527_v0  ;;  %1978 = vmatprep.subr.bf16.mxu0 %v2527_v0  ;;  %p3291_p12 = scmp.ne.s32.totalorder %s3288_s1, 0 }
 0x10a   : > { %1975 = vmatmul.mubr.msk.bf16.vlgmr.msra.gmra.mrb[0].mxu1 %vm731_vm1, %v691_v13  ;;  %1963 = vmatmul.mubr.msk.bf16.vlgmr.msra.gmra.mrb[0].mxu0 %vm731_vm1, %v688_v14 }
 0x10b   : > { %1992 = vmatprep.mubr.msk.bf16.mxu1 %vm2528_vm0, %v2527_v0  ;;  %1986 = vmatprep.mubr.msk.bf16.mxu0 %vm2528_vm0, %v2527_v0 }
 0x10c   : > { %1979 = vmatpush3.bf16.msra.mxu0 %v2180_v15 }
 0x10d   : > { %1980 = vmatprep.subr.bf16.mxu0 %v2527_v0 }
 0x110   : > { %1981 = vmatpush3.bf16.msra.mxu0 %v2181_v16  ;;  %v1264_v16 = vld [vmem:[#allocation2 + $0x10] sm:$0xff] }
 0x111   : > { %1982 = vmatprep.subr.bf16.mxu0 %v2527_v0 }
 0x114   : > { %1983 = vmatpush3.bf16.msra.mxu0 %v2182_v17 }
 0x115   : > { %1984 = vmatprep.subr.bf16.mxu0 %v2527_v0 }
 0x118   : > { %1985 = vmatpush3.bf16.msra.mxu0 %v2183_v18 }
 0x119   : > { %2014 = vmatprep.subr.bf16.mxu0 %v2527_v0 }
 0x11b   : > { %1987 = vmatmul.mubr.msk.bf16.vlgmr.msra.gmra.mrb[4].mxu0 %vm731_vm1, %v689_v8 }
 0x11c   : > { %2016 = vmatprep.mubr.msk.bf16.mxu0 %vm2528_vm0, %v2527_v0 }
 0x1dd   : > { %v851_v21 = vpop.f32.mrb[0].mxu1  ;;  %v769_v24 = vpop.f32.mrb[0].mxu0 }
 0x1de   : > { %v852_v22 = vadd.f32 %v1886_v19, %v851_v21  ;;  %v1976_v23 = vpop.f32.mrb[1].mxu1  ;;  %v770_v26 = vadd.f32 %v1880_v20, %v769_v24  ;;  %v1964_v27 = vpop.f32.mrb[1].mxu0 }
 0x1df   : > { %v854_v25 = vpop.f32.mrb[2].mxu1  ;;  %v772_v30 = vpop.f32.mrb[2].mxu0 }
 0x1e0   : > { %v940_v28 = vpack.c.bf16 %v852_v22, %v852_v22  ;;  %v1977_v29 = vpop.f32.mrb[3].mxu1  ;;  %v1965_v31 = vpop.f32.mrb[3].mxu0  ;;  %v939_v32 = vpack.c.bf16 %v770_v26, %v770_v26 }
 0x1e2   : > { %1077 = vrot.lane.b32.xlu1 %v940_v28, %s2529_s13  ;;  %v947_v33 = vsel %vm681_vm2, %v940_v28, 0 }
 0x1e3   : > { %1991 = vmatpush3.bf16.xpose.msra.mxu1 %v947_v33 }
 0x1e4   : > { %1996 = vmatprep.subr.bf16.mxu1 %v2527_v0 }
 0x1e6   : > { %1074 = vrot.lane.b32.xlu1 %v939_v32, %s2529_s13 }
 0x1ea   : > { %1214 = vrot.lane.b32.xlu1 %v940_v28, %s2530_s26  ;;  %1993 = vmatmul.mubr.msk.bf16.vlgmr.msra.gmra.mrb[4].mxu1 %vm681_vm2, %v939_v32 }
 0x1eb   : > { %1998 = vmatprep.mubr.msk.bf16.mxu1 %vm2528_vm0, %v2527_v0 }
 0x1ee   : > { %1212 = vrot.lane.b32.xlu1 %v939_v32, %s2530_s26  ;;  %v933_v42 = vpop.f32.mrb[4].mxu0 }
 0x1ef   : > { %v1988_v43 = vpop.f32.mrb[5].mxu0  ;;  %v934_v1 = vadd.f32 %v1892_v62, %v933_v42 }
 0x1f0   : > { %v936_v44 = vpop.f32.mrb[6].mxu0  ;;  %v1127_v43 = vld [vmem:[#allocation2 + $0x8] sm:$0xff] }
 0x1f1   : > { %v1989_v45 = vpop.f32.mrb[7].mxu0  ;;  %v3052_v5 = vpack.c.bf16 %v934_v1, %v934_v1 }
 0x1f2   : > { %1350 = vrot.lane.b32.xlu1 %v940_v28, %s2531_s10 }
 0x1f3   : > { %v1028_v6 = vsel %vm1026_vm5, %v3052_v5, 0 }
 0x1f4   : > { %1997 = vmatpush3.bf16.msra.mxu1 %v1028_v6 }
 0x1f5   : > { %2002 = vmatprep.subr.bf16.mxu1 %v2527_v0 }
 0x1f6   : > { %1348 = vrot.lane.b32.xlu1 %v939_v32, %s2531_s10 }
 0x254   : > { %v3012_v34 = vpop.permute.xlu1 %1077 }
 0x255   : > { %v1083_v15 = vsel %vm681_vm2, %v3012_v34, 0 }
 0x258   : > { %v3014_v35 = vpop.permute.xlu1 %1074 }
 0x25c   : > { %v1215_v36 = vpop.permute.xlu1 %1214 }
 0x25d   : > { %v1220_v37 = vsel %vm681_vm2, %v1215_v36, 0 }
 0x25e   : > { %2015 = vmatpush3.bf16.xpose.msra.mxu0 %v1220_v37 }
 0x25f   : > { %2026 = vmatprep.subr.bf16.mxu0 %v2527_v0 }
 0x260   : > { %v1213_v38 = vpop.permute.xlu1 %1212 }
 0x264   : > { %v1351_v39 = vpop.permute.xlu1 %1350 }
 0x265   : > { %v1356_v40 = vsel %vm681_vm2, %v1351_v39, 0  ;;  %2017 = vmatmul.mubr.msk.bf16.vlgmr.msra.gmra.mrb[8].mxu0 %vm681_vm2, %v1213_v38  ;;  %v1281_v39 = vld [vmem:[#allocation3 + $0x10] sm:$0xff] }
 0x266   : > { %2027 = vmatpush3.bf16.xpose.msra.mxu0 %v1356_v40  ;;  %2028 = vmatprep.mubr.msk.bf16.mxu0 %vm2528_vm0, %v2527_v0 }
 0x267   : > { %2038 = vmatprep.subr.bf16.mxu0 %v2527_v0 }
 0x268   : > { %v1349_v41 = vpop.permute.xlu1 %1348 }
 0x26d   : > { %2029 = vmatmul.mubr.msk.bf16.vlgmr.msra.gmra.mrb[12].mxu0 %vm681_vm2, %v1349_v41 }
 0x26e   : > { %2046 = vmatprep.mubr.msk.bf16.mxu0 %vm2528_vm0, %v2527_v0 }
 0x2bd   : > { %v983_v46 = vpop.f32.mrb[4].mxu1 }
 0x2be   : > { %v989_v47 = vmul.f32 0.25, %v983_v46  ;;  %v1994_v48 = vpop.f32.mrb[5].mxu1  ;;  %v1400_v46 = vld [vmem:[#allocation2 + $0x18] sm:$0xff] }
 0x2bf   : > { %v986_v49 = vpop.f32.mrb[6].mxu1 }
 0x2c0   : > { %v1995_v50 = vpop.f32.mrb[7].mxu1  ;;  %v992_v51 = vsel %vm991_vm3, %v989_v47, -inf }
 0x2c1   : > { %993 = vmax.xlane.f32.xlu0 %v992_v51 }
 0x338   : > { %v1256_v54 = vpop.f32.mrb[8].mxu0 }
 0x339   : > { %v2018_v55 = vpop.f32.mrb[9].mxu0  ;;  %v1262_v7 = vmul.f32 0.25, %v1256_v54 }
 0x33a   : > { %v1259_v56 = vpop.f32.mrb[10].mxu0 }
 0x33b   : > { %v2019_v57 = vpop.f32.mrb[11].mxu0  ;;  %v1265_v8 = vsel %vm991_vm3, %v1262_v7, -inf }
 0x340   : > { %v1392_v58 = vpop.f32.mrb[12].mxu0 }
 0x341   : > { %v2030_v59 = vpop.f32.mrb[13].mxu0  ;;  %v1398_v33 = vmul.f32 0.25, %v1392_v58 }
 0x342   : > { %v1395_v60 = vpop.f32.mrb[14].mxu0 }
 0x343   : > { %v2031_v61 = vpop.f32.mrb[15].mxu0  ;;  %v1401_v36 = vsel %vm991_vm3, %v1398_v33, -inf }
 0x34e   : > { %v994_v2 = vpop.xlane.xlu0 %993 }
 0x34f   : > { %v3045_v3 = vmax.f32 %v3042_v63, %v994_v2 }
 0x351   : > { %v996_v4 = vsub.f32 %v3042_v63, %v3045_v3  ;;  %1072 = vst.msk [vmem:[#allocation2] sm:$0xff] %vm672_vm4, %v3045_v3  ;;  %1001 = vperm.xlu0 %2170, %v3045_v3  }
 0x370   : > { %1266 = vmax.xlane.f32.xlu0 %v1265_v8 }
 0x3d0   : > { %v1002_v9 = vpop.permute.xlu0 %1001 }
 0x3d1   : > { %v1004_v10 = vsub.f32 %v989_v47, %v1002_v9 }
 0x3d3   : > { %v1005_v12 = vmul.f32 1.442695, %v1004_v10 }
 0x3d5   : > { %2188 = vpow2.f32 %v1005_v12 }
 0x3df   : > { %v3058_v13 = vpop.eup %2188 }
 0x3e0   : > { %v1022_v14 = vpack.c.bf16 %v3058_v13, %v3058_v13 }
 0x3e2   : > { %1999 = vmatmul.mubr.msk.bf16.vlgmr.msra.gmra.mrb[8].mxu1 %vm991_vm3, %v1022_v14 }
 0x3e3   : > { %2003 = vmatpush3.bf16.xpose.msra.mxu1 %v1083_v15  ;;  %2004 = vmatprep.mubr.msk.bf16.mxu1 %vm2528_vm0, %v2527_v0  ;;  %v997_v15 = vmul.f32 1.442695, %v996_v4 }
 0x3e4   : > { %2008 = vmatprep.subr.bf16.mxu1 %v2527_v0 }
 0x3ea   : > { %2005 = vmatmul.mubr.msk.bf16.vlgmr.msra.gmra.mrb[12].mxu1 %vm681_vm2, %v3014_v35 }
 0x3eb   : > { %2010 = vmatprep.mubr.msk.bf16.mxu1 %vm2528_vm0, %v2527_v0 }
 0x3fd   : > { %v1267_v17 = vpop.xlane.xlu0 %1266 }
 0x3fe   : > { %v1268_v18 = vmax.f32 %v1264_v16, %v1267_v17 }
 0x400   : > { %v1269_v19 = vsub.f32 %v1264_v16, %v1268_v18  ;;  %1347 = vst.msk [vmem:[#allocation2 + $0x10] sm:$0xff] %vm672_vm4, %v1268_v18  ;;  %1274 = vperm.xlu0 %2170, %v1268_v18  }
 0x402   : > { %v1270_v37 = vmul.f32 1.442695, %v1269_v19 }
 0x47f   : > { %v1275_v20 = vpop.permute.xlu0 %1274 }
 0x480   : > { %v1277_v21 = vsub.f32 %v1262_v7, %v1275_v20  ;;  %v1144_v20 = vld [vmem:[#allocation3 + $0x8] sm:$0xff] }
 0x482   : > { %v1278_v22 = vmul.f32 1.442695, %v1277_v21 }
 0x484   : > { %2190 = vpow2.f32 %v1278_v22 }
 0x485   : > { %2192 = vpow2.f32 %v1270_v37 }
 0x48e   : > { %v3073_v23 = vpop.eup %2190 }
 0x48f   : > { %v1283_v24 = vsel %vm991_vm3, %v3073_v23, 0.0  ;;  %v2193_v38 = vpop.eup %2192  ;;  %v1296_v8 = vpack.c.bf16 %v3073_v23, %v3073_v23  ;;  %v1007_v23 = vld [vmem:[#allocation3] sm:$0xff] }
 0x490   : > { %1284 = vadd.xlane.f32.xlu0 %v1283_v24  ;;  %v1282_v40 = vmul.f32 %v2193_v38, %v1281_v39  ;;  %v1417_v24 = vld [vmem:[#allocation3 + $0x18] sm:$0xff] }
 0x4b5   : > { %v3077_v25 = vpop.f32.mrb[8].mxu1 }
 0x4b6   : > { %v2000_v26 = vpop.f32.mrb[9].mxu1 }
 0x4b7   : > { %v1067_v27 = vpop.f32.mrb[10].mxu1 }
 0x4b8   : > { %v2001_v28 = vpop.f32.mrb[11].mxu1 }
 0x4bd   : > { %v1119_v29 = vpop.f32.mrb[12].mxu1 }
 0x4be   : > { %v1125_v30 = vmul.f32 0.25, %v1119_v29  ;;  %v2006_v31 = vpop.f32.mrb[13].mxu1 }
 0x4bf   : > { %v1122_v32 = vpop.f32.mrb[14].mxu1 }
 0x4c0   : > { %v2007_v34 = vpop.f32.mrb[15].mxu1  ;;  %v1128_v35 = vsel %vm991_vm3, %v1125_v30, -inf }
 0x4c1   : > { %1129 = vmax.xlane.f32.xlu1 %v1128_v35 }
 0x4c5   : > { %1402 = vmax.xlane.f32.xlu1 %v1401_v36  ;;  %v1015_v36 = vld [vmem:[#allocation4] sm:$0xff] }
 0x51d   : > { %v1285_v41 = vpop.xlane.xlu0 %1284 }
 0x51e   : > { %v1286_v42 = vadd.f32 %v1285_v41, %v1282_v40 }
 0x520   : > { %1287 = vst.msk [vmem:[#allocation3 + $0x10] sm:$0xff] %vm672_vm4, %v1286_v42 }
 0x527   : > { %v1512_v14 = vld [vmem:[#allocation3 + $0x10] sm:$0xff] }
 0x54e   : > { %v1130_v44 = vpop.xlane.xlu1 %1129 }
 0x54f   : > { %v1131_v45 = vmax.f32 %v1127_v43, %v1130_v44 }
 0x551   : > { %v1132_v47 = vsub.f32 %v1127_v43, %v1131_v45  ;;  %1211 = vst.msk [vmem:[#allocation2 + $0x8] sm:$0xff] %vm672_vm4, %v1131_v45  ;;  %1137 = vperm.xlu1 %2171, %v1131_v45   ;;  %v1152_v43 = vld [vmem:[#allocation4 + $0x8] sm:$0xff] }
 0x552   : > { %v1403_v48 = vpop.xlane.xlu1 %1402 }
 0x553   : > { %v1404_v49 = vmax.f32 %v1400_v46, %v1403_v48  ;;  %v1133_v12 = vmul.f32 1.442695, %v1132_v47 }
 0x555   : > { %v1405_v50 = vsub.f32 %v1400_v46, %v1404_v49  ;;  %1483 = vst.msk [vmem:[#allocation2 + $0x18] sm:$0xff] %vm672_vm4, %v1404_v49  ;;  %1410 = vperm.xlu1 %2171, %v1404_v49  }
 0x557   : > { %v1406_v10 = vmul.f32 1.442695, %v1405_v50 }
 0x559   : > { %1161 = vrot.lane.b32.xlu1 %v3052_v5, %s2529_s13  ;;  %s3286_s13 = sld [smem:[#allocation26_spill]] }
 0x55d   : > { %1297 = vrot.lane.b32.xlu1 %v3052_v5, %s2530_s26 }
 0x561   : > { %1433 = vrot.lane.b32.xlu1 %v3052_v5, %s2531_s10  ;;  %v1009_v5 = vsel %vm991_vm3, %v3058_v13, 0.0 }
 0x5d0   : > { %v1138_v51 = vpop.permute.xlu1 %1137 }
 0x5d1   : > { %v1140_v52 = vsub.f32 %v1125_v30, %v1138_v51  ;;  %v1289_v51 = vld [vmem:[#allocation4 + $0x10] sm:$0xff] }
 0x5d3   : > { %v1141_v53 = vmul.f32 1.442695, %v1140_v52 }
 0x5d4   : > { %v1411_v54 = vpop.permute.xlu1 %1410 }
 0x5d5   : > { %2194 = vpow2.f32 %v1141_v53  ;;  %v1413_v55 = vsub.f32 %v1398_v33, %v1411_v54 }
 0x5d7   : > { %v1414_v56 = vmul.f32 1.442695, %v1413_v55 }
 0x5d8   : > { %v1162_v57 = vpop.permute.xlu1 %1161 }
 0x5d9   : > { %2196 = vpow2.f32 %v1414_v56  ;;  %v1167_v58 = vsel %vm1026_vm5, %v1162_v57, 0 }
 0x5da   : > { %2009 = vmatpush3.bf16.msra.mxu1 %v1167_v58  ;;  %2198 = vpow2.f32 %v1406_v10  ;;  %v1425_v58 = vld [vmem:[#allocation4 + $0x18] sm:$0xff] }
 0x5db   : > { %2020 = vmatprep.subr.bf16.mxu1 %v2527_v0  ;;  %2200 = vpow2.f32 %v1133_v12 }
 0x5dc   : > { %v1298_v60 = vpop.permute.xlu1 %1297  ;;  %2202 = vrcp.f32 %v1512_v14 }
 0x5dd   : > { %v1303_v1 = vsel %vm1026_vm5, %v1298_v60, 0  ;;  %2204 = vpow2.f32 %v997_v15 }
 0x5df   : > { %v2195_v59 = vpop.eup %2194 }
 0x5e0   : > { %v1146_v61 = vsel %vm991_vm3, %v2195_v59, 0.0  ;;  %v1159_v62 = vpack.c.bf16 %v2195_v59, %v2195_v59  ;;  %v1434_v7 = vpop.permute.xlu1 %1433 }
 0x5e1   : > { %1147 = vadd.xlane.f32.xlu1 %v1146_v61  ;;  %v1439_v9 = vsel %vm1026_vm5, %v1434_v7, 0  ;;  %v2185_v7 = vld [vmem:[%s3284_s20 + $0x8] sm:$0xff]  }
 0x5e2   : > { %2011 = vmatmul.mubr.msk.bf16.vlgmr.msra.gmra.mrb[16].mxu1 %vm991_vm3, %v1159_v62 }
 0x5e3   : > { %v2197_v2 = vpop.eup %2196  ;;  %2021 = vmatpush3.bf16.msra.mxu1 %v1303_v1  ;;  %2022 = vmatprep.mubr.msk.bf16.mxu1 %vm2528_vm0, %v2527_v0 }
 0x5e4   : > { %v1419_v6 = vsel %vm991_vm3, %v2197_v2, 0.0  ;;  %2032 = vmatprep.subr.bf16.mxu1 %v2527_v0  ;;  %v1432_v13 = vpack.c.bf16 %v2197_v2, %v2197_v2  ;;  %v2199_v16 = vpop.eup %2198 }
 0x5e5   : > { %1010 = vadd.xlane.f32.xlu1 %v1009_v5  ;;  %1420 = vadd.xlane.f32.xlu0 %v1419_v6  ;;  %v2201_v17 = vpop.eup %2200  ;;  %v1418_v3 = vmul.f32 %v2199_v16, %v1417_v24  ;;  %v1906_v24 = vld [vmem:[%s3285_s25] ss:$0 sm:$0xff] }
 0x5e6   : > { %v2203_v18 = vpop.eup %2202  ;;  %v1145_v21 = vmul.f32 %v2201_v17, %v1144_v20 }
 0x5e7   : > { %v2205_v19 = vpop.eup %2204 }
 0x5e8   : > { %v1008_v63 = vmul.f32 %v2205_v19, %v1007_v23 }
 0x5ea   : > { %2023 = vmatmul.mubr.msk.bf16.vlgmr.msra.gmra.mrb[20].mxu1 %vm991_vm3, %v1296_v8  ;;  %v2186_v8 = vld [vmem:[%s3284_s20 + $0x10] sm:$0xff]  }
 0x5eb   : > { %2033 = vmatpush3.bf16.msra.mxu1 %v1439_v9  ;;  %2034 = vmatprep.mubr.msk.bf16.mxu1 %vm2528_vm0, %v2527_v0  ;;  %v2187_v9 = vld [vmem:[%s3284_s20 + $0x18] sm:$0xff]  }
 0x5f2   : > { %2035 = vmatmul.mubr.msk.bf16.vlgmr.msra.gmra.mrb[24].mxu1 %vm991_vm3, %v1432_v13 }
 0x5f6   : > { %1292 = vperm.xlu1 %2171, %v2193_v38  }
 0x5fa   : > { %1428 = vperm.xlu1 %2171, %v2199_v16  }
 0x5fb   : > { %1155 = vperm.xlu0 %2170, %v2201_v17  }
 0x5fe   : > { %1517 = vperm.xlu1 %2171, %v2203_v18  }
 0x602   : > { %1018 = vperm.xlu1 %2171, %v2205_v19  }
 0x66e   : > { %v1148_v22 = vpop.xlane.xlu1 %1147 }
 0x66f   : > { %v1149_v26 = vadd.f32 %v1148_v22, %v1145_v21 }
 0x671   : > { %1150 = vst.msk [vmem:[#allocation3 + $0x8] sm:$0xff] %vm672_vm4, %v1149_v26  ;;  %v1626_v26 = vunpack.c.l.bf16 %v2965_v11 }
 0x672   : > { %v1011_v4 = vpop.xlane.xlu1 %1010  ;;  %v1421_v27 = vpop.xlane.xlu0 %1420 }
 0x673   : > { %v1012_v28 = vadd.f32 %v1011_v4, %v1008_v63  ;;  %v1422_v29 = vadd.f32 %v1421_v27, %v1418_v3 }
 0x675   : > { %1014 = vst.msk [vmem:[#allocation3] sm:$0xff] %vm672_vm4, %v1012_v28  ;;  %1423 = vst.msk [vmem:[#allocation3 + $0x18] sm:$0xff] %vm672_vm4, %v1422_v29 }
 0x676   : > { %v1293_v30 = vpop.permute.xlu1 %1292 }
 0x677   : > { %v1295_v52 = vmul.f32 %v1293_v30, %v1289_v51 }
 0x678   : > { %v1497_v31 = vld [vmem:[#allocation3 + $0x8] sm:$0xff] }
 0x679   : > { %2206 = vrcp.f32 %v1497_v31 }
 0x67a   : > { %v1429_v32 = vpop.permute.xlu1 %1428  ;;  %v1156_v44 = vpop.permute.xlu0 %1155 }
 0x67b   : > { %v1158_v45 = vmul.f32 %v1156_v44, %v1152_v43  ;;  %v1431_v59 = vmul.f32 %v1429_v32, %v1425_v58 }
 0x67c   : > { %v1527_v33 = vld [vmem:[#allocation3 + $0x18] sm:$0xff]  ;;  %v1487_v35 = vld [vmem:[#allocation3] sm:$0xff] }
 0x67d   : > { %2208 = vrcp.f32 %v1527_v33 }
 0x67e   : > { %v1518_v34 = vpop.permute.xlu1 %1517  ;;  %2210 = vrcp.f32 %v1487_v35 }
 0x682   : > { %v1019_v37 = vpop.permute.xlu1 %1018 }
 0x683   : > { %v2207_v38 = vpop.eup %2206  ;;  %v1021_v39 = vmul.f32 %v1019_v37, %v1015_v36 }
 0x684   : > { %1502 = vperm.xlu0 %2170, %v2207_v38  }
 0x685   : > { %v1070_v40 = vadd.f32 %v3077_v25, %v1021_v39  ;;  %v2184_v25 = vld [vmem:[%s3284_s20] sm:$0xff]  }
 0x686   : > { %2039 = vmatpush3.bf16.msra.mxu0 %v2184_v25  ;;  %v1912_v39 = vld [vmem:[%s3287_s12] ss:$0 sm:$0xff] }
 0x687   : > { %v2209_v41 = vpop.eup %2208  ;;  %1071 = vst.msk [vmem:[#allocation4] sm:$0xff] %vm681_vm2, %v1070_v40  ;;  %2040 = vmatprep.subr.bf16.mxu0 %v2527_v0 }
 0x688   : > { %1532 = vperm.xlu0 %2170, %v2209_v41   ;;  %v2211_v42 = vpop.eup %2210  ;;  %v1913_v41 = vld [vmem:[%s3289_s17] ss:$0 sm:$0xff] }
 0x68a   : > { %2041 = vmatpush3.bf16.msra.mxu0 %v2185_v7 }
 0x68b   : > { %2042 = vmatprep.subr.bf16.mxu0 %v2527_v0 }
 0x68c   : > { %1492 = vperm.xlu0 %2170, %v2211_v42  }
 0x68e   : > { %2043 = vmatpush3.bf16.msra.mxu0 %v2186_v8  ;;  %v1489_v17 = vld [vmem:[#allocation4] sm:$0xff] }
 0x68f   : > { %2044 = vmatprep.subr.bf16.mxu0 %v2527_v0 }
 0x692   : > { %2045 = vmatpush3.bf16.msra.mxu0 %v2187_v9 }
 0x6b5   : > { %v1203_v46 = vpop.f32.mrb[16].mxu1 }
 0x6b6   : > { %v1209_v47 = vadd.f32 %v1203_v46, %v1158_v45  ;;  %v2012_v48 = vpop.f32.mrb[17].mxu1 }
 0x6b7   : > { %v1206_v49 = vpop.f32.mrb[18].mxu1 }
 0x6b8   : > { %1210 = vst.msk [vmem:[#allocation4 + $0x8] sm:$0xff] %vm681_vm2, %v1209_v47  ;;  %v2013_v50 = vpop.f32.mrb[19].mxu1 }
 0x6bd   : > { %v1339_v53 = vpop.f32.mrb[20].mxu1 }
 0x6be   : > { %v1345_v54 = vadd.f32 %v1339_v53, %v1295_v52  ;;  %v2024_v55 = vpop.f32.mrb[21].mxu1 }
 0x6bf   : > { %v1342_v56 = vpop.f32.mrb[22].mxu1  ;;  %v1499_v10 = vld [vmem:[#allocation4 + $0x8] sm:$0xff] }
 0x6c0   : > { %1346 = vst.msk [vmem:[#allocation4 + $0x10] sm:$0xff] %vm681_vm2, %v1345_v54  ;;  %v2025_v57 = vpop.f32.mrb[23].mxu1 }
 0x6c5   : > { %v1475_v60 = vpop.f32.mrb[24].mxu1 }
 0x6c6   : > { %v1481_v61 = vadd.f32 %v1475_v60, %v1431_v59  ;;  %v2036_v62 = vpop.f32.mrb[25].mxu1 }
 0x6c7   : > { %v1478_v1 = vpop.f32.mrb[26].mxu1  ;;  %v1514_v2 = vld [vmem:[#allocation4 + $0x10] sm:$0xff] }
 0x6c8   : > { %1482 = vst.msk [vmem:[#allocation4 + $0x18] sm:$0xff] %vm681_vm2, %v1481_v61  ;;  %v2037_v5 = vpop.f32.mrb[27].mxu1  ;;  %v1520_v6 = vmul.f32 %v1518_v34, %v1514_v2 }
 0x6ca   : > { %1522 = vrot.lane.b32.xlu0 %v1520_v6, %s2534_s9  ;;  %s1915_s9 = sshll.u32 %s3286_s13, 6 }
 0x6cb   : > { %s3153_s6 = scalar_lea.hbm %s3290_s0, %s1915_s9 }
 0x6cf   : > { %v1529_v15 = vld [vmem:[#allocation4 + $0x18] sm:$0xff] }
 0x703   : > { %v1503_v12 = vpop.permute.xlu0 %1502 }
 0x704   : > { %v1505_v13 = vmul.f32 %v1503_v12, %v1499_v10 }
 0x706   : > { %1507 = vrot.lane.b32.xlu1 %v1505_v13, %s2535_s22  ;;  %s1662_s22 = scalar_lea.sflag [#allocation8], %s2918_s16 }
 0x707   : > { %v1533_v14 = vpop.permute.xlu0 %1532 }
 0x708   : > { %v1535_v16 = vmul.f32 %v1533_v14, %v1529_v15 }
 0x70a   : > { %1537 = vrot.lane.b32.xlu1 %v1535_v16, %s2536_s19  ;;  %s2418_s19 = scalar_lea.vmem %s3155_s23, 64 }
 0x70b   : > { %v1493_v18 = vpop.permute.xlu0 %1492  ;;  %p2419_p13 = scmp.ne.s32.totalorder %s3155_s23, %s2418_s19  ;;  %p2426_p9 = scmp.lt.s32.totalorder %s2424_s11, %s2418_s19 }
 0x70c   : > { %v1495_v19 = vmul.f32 %v1493_v18, %v1489_v17 }
 0x70d   : > { %p2420_p3 = pnand %p2419_p13, %p3291_p12  ;;  %p2427_p5 = por %p2426_p9, %p2425_p11 }
 0x70e   : > { %1496 = vst.msk [vmem:[#allocation5] sm:$0xff] %vm681_vm2, %v1495_v19 }
 0x70f   : > { %p2421_p0 = pneg %p2420_p3 }
 0x711   : > { %p2428_p7 = pnand %p2427_p5, %p2421_p0 }
 0x73c   : > { %v1523_v0 = vpop.permute.xlu0 %1522 }
 0x778   : > { %v1508_v20 = vpop.permute.xlu1 %1507 }
 0x779   : > { %1511 = vst.msk [vmem:[#allocation5] sm:$0xff] %vm1510_vm6, %v1508_v20 }
 0x77a   : > { %1526 = vst.msk [vmem:[#allocation5] sm:$0xff] %vm1525_vm7, %v1523_v0 }
 0x77c   : > { %v1538_v21 = vpop.permute.xlu1 %1537 }
 0x77d   : > { %1541 = vst.msk [vmem:[#allocation5] sm:$0xff] %vm1540_vm8, %v1538_v21 }
 0x784   : > { %v1542_v22 = vld [vmem:[#allocation5] sm:$0xff] }
 0x785   : > { %v1543_v23 = vpack.c.bf16 %v1542_v22, %v1542_v22 }
 0x787   : > { %2047 = vmatmul.mubr.msk.bf16.vlgmr.msra.gmra.mrb[16].mxu0 %vm731_vm1, %v1543_v23 }
 0x85a   : > { %v1620_v63 = vpop.f32.mrb[16].mxu0 }
 0x85b   : > { %v1621_v3 = vadd.f32 %v1906_v24, %v1620_v63  ;;  %v2048_v4 = vpop.f32.mrb[17].mxu0 }
 0x85c   : > { %v1623_v27 = vpop.f32.mrb[18].mxu0 }
 0x85d   : > { %v2049_v28 = vpop.f32.mrb[19].mxu0  ;;  %v1627_v29 = vadd.f32 %v1626_v26, %v1621_v3 }
 0x85f   : > { %v1628_v30 = vsel %vm731_vm1, %v1627_v29, 0.0 }
 0x860   : > { %1629 = vadd.xlane.f32.xlu0 %v1628_v30 }
 0x8ed   : > { %v1630_v31 = vpop.xlane.xlu0 %1629 }
 0x8ee   : > { %v1632_v32 = vmul.f32 0.015625, %v1630_v31 }
 0x8f0   : > { %v1633_v33 = vsub.f32 %v1627_v29, %v1632_v32 }
 0x8f2   : > { %v1634_v34 = vmul.f32 %v1633_v33, %v1633_v33 }
 0x8f4   : > { %v1635_v35 = vsel %vm731_vm1, %v1634_v34, 0.0 }
 0x8f5   : > { %1636 = vadd.xlane.f32.xlu1 %v1635_v35 }
 0x982   : > { %v1637_v36 = vpop.xlane.xlu1 %1636 }
 0x983   : > { %v1638_v11 = vmul.f32 0.015625, %v1637_v36 }
 0x985   : > { %v1639_v37 = vadd.f32 1e-05, %v1638_v11 }
 0x987   : > { %2212 = vrsqrt.f32 %v1639_v37 }
 0x991   : > { %v2213_v38 = vpop.eup %2212 }
 0x992   : > { %v1641_v40 = vmul.f32 %v2213_v38, %v1633_v33 }
 0x994   : > { %v1649_v42 = vmul.f32 %v1912_v39, %v1641_v40 }
 0x996   : > { %v1657_v43 = vadd.f32 %v1913_v41, %v1649_v42 }
 0x998   : > { %v1658_v44 = vpack.c.bf16 %v1657_v43, %v1657_v43 }
 0x99a   : > { %1660 = vst.msk [vmem:[%s666_s28] sm:$0xf] %vm1659_vm9, %v1658_v44 }
 0x99b   : > { %2431 = shalt.err (!%p2428_p7)
}
 0x99c   : > { %s2432_s16 = scalar_lea.hbm %s3153_s6, 64  ;;  %s2436_s26 = scalar_lea.hbm %s3290_s0, 128 }
 0x99d   : > { %p2433_p10 = scmp.ne.s32.totalorder %s3153_s6, %s2432_s16  ;;  %p2437_p4 = scmp.lt.u32.totalorder %s3153_s6, %s3290_s0 }
 0x99e   : > { %p2438_p1 = scmp.lt.u32.totalorder %s2436_s26, %s2432_s16  ;;  %p2440_p13 = scmp.lt.u32.totalorder %s2432_s16, %s3153_s6 }
 0x99f   : > { %p2434_p6 = pnand %p2433_p10, %p3291_p12 }
 0x9a0   : > { %p2439_p8 = por %p2438_p1, %p2437_p4 }
 0x9a1   : > { %p2435_p2 = pneg %p2434_p6 }
 0x9a2   : > { %p2441_p3 = por %p2440_p13, %p2439_p8 }
 0x9a4   : > { %p2442_p0 = pnand %p2441_p3, %p2435_p2 }
 0x9a6   : > { %2445 = shalt.err (!%p2442_p0)
}
 0x9a7   : > { %2070 = dma.vmem_to_hbm [thread:$0]  (%p3291_p12), %s3155_s23, 64, %s3153_s6, %s1662_s22  }
 0x9a8 PF: > { %s3292_s4 = sld [smem:[#allocation25_spill]]  ;;  %s3293_s24 = sld [smem:[#allocation28_spill]] }
 0x9a9   : > { %p3295_p9 = scmp.ge.s32.totalorder %s2516_s18, 2 }
 0x9ae   : > { %s1688_s17 = sand.u32 1, %s3292_s4   ;;  %p3294_p11 = scmp.ne.s32.totalorder %s3293_s24, 0 }
 0x9af   : > { %s1689_s9 = scalar_lea.sflag [#allocation8], %s1688_s17 }
 0x9b0   : > { %p2096_p5 = pnand %p3295_p9, %p3294_p11 }
 0x9b2   : > { %2491 = dma.done.wait (!%p2096_p5), %s1689_s9, 64  }
 0x9b3   : > { %2493 = vsyncadd (!%p2096_p5), %s1689_s9, 4294967232  ;;  %s37_s18 = sadd.s32 1, %s2516_s18   ;;  %s3296_s1 = sld [smem:[#allocation31_spill]] }
 0x9b4   : > { %p34_p7 = scmp.ge.s32.totalorder %s37_s18, 4   ;;  %s3297_s16 = sld [smem:[#allocation27_spill]] }
 0x9b5   : > { %s3298_s17 = sld [smem:[#allocation29_spill]]  ;;  %s3299_s29 = smov %s2500_s30 }
 0x9b6   : > { %s3300_s30 = smov %s2504_s15  ;;  %36 = sbr.rel (!%p34_p7) target bundleno = 22 (0x16), region = 187 }
 0x9b9   : > { %s3301_s15 = smov %s3296_s1 }
 0x9bd   :  { %1694 = vsyncpa [#allocation7], 1 }
 0x9be   :  { %1696 = vsyncpa [#allocation7 + $0x1], 1 }
 0x9bf   :  { %1697 = vsyncpa [#allocation10], 1 }
 0x9c0   :  { %1699 = vsyncpa [#allocation10 + $0x1], 1 }
 0x9c1   :  { %1700 = vsyncpa [#allocation13], 1 }
 0x9c2   :  { %1702 = vsyncpa [#allocation13 + $0x1], 1 }
 0x9c3   :  { %1703 = vsyncpa [#allocation16], 1 }
 0x9c4   :  { %1704 = vsyncpa [#allocation8], 1 }
 0x9c5   :  { %1706 = vsyncpa [#allocation8 + $0x1], 1 }

</bundles_post_ra>
